<compile_context>
chip_gen: v7x
topology: tpu7x:2x2x1
jax: 0.10.0
libtpu: 0.0.40
codegen_flags: <defaults>
</compile_context>

<pallas_src>
import numpy as np
import jax
import jax.numpy as jnp
from jax.experimental import pallas as pl
from jax.experimental.pallas import tpu as pltpu

F32 = jnp.float32
BN_EPS = 1e-5
LANE = 128

VMEM_SPEC = pl.BlockSpec(memory_space=pltpu.MemorySpace.VMEM)


def _round_up(x, m):
    return (x + m - 1) // m * m


# ---------------------------------------------------------------------------
# Fused kernel
# ---------------------------------------------------------------------------

def make_tfn_kernel(seq_len, batch, text_hidden, out_range, out_shift):
    S, B, H = seq_len, batch, text_hidden

    def kernel(audio_ref, video_ref, textf_ref,
               a_scale_ref, a_bias_ref, a_w1_ref, a_b1_ref, a_w2_ref, a_b2_ref, a_w3_ref, a_b3_ref,
               v_scale_ref, v_bias_ref, v_w1_ref, v_b1_ref, v_w2_ref, v_b2_ref, v_w3_ref, v_b3_ref,
               wih_ref, whh_ref, lb_ref,
               wt_ref, bt_ref,
               ea0_ref, ea_ref, ev0_ref, ev_ref, et0_ref, et_ref,
               pf1w_ref, pf1b_ref, pf2w_ref, pf2b_ref, pf3w_ref, pf3b_ref,
               out_ref):

        def dense(x, w_ref, b_ref, relu=True):
            y = jnp.dot(x, w_ref[...], preferred_element_type=F32) + b_ref[...]
            return jnp.maximum(y, 0.0) if relu else y

        def subnet(x_ref, scale_ref, bias_ref, w1_ref, b1_ref, w2_ref, b2_ref, w3_ref, b3_ref):
            # BatchNorm1d (eval) folded to scale/bias; Dropout = identity (eval).
            y = x_ref[...] * scale_ref[...] + bias_ref[...]
            y = dense(y, w1_ref, b1_ref)
            y = dense(y, w2_ref, b2_ref)
            y = dense(y, w3_ref, b3_ref)
            return y

        audio_h = subnet(audio_ref, a_scale_ref, a_bias_ref, a_w1_ref, a_b1_ref,
                         a_w2_ref, a_b2_ref, a_w3_ref, a_b3_ref)
        video_h = subnet(video_ref, v_scale_ref, v_bias_ref, v_w1_ref, v_b1_ref,
                         v_w2_ref, v_b2_ref, v_w3_ref, v_b3_ref)

        # ---- TextSubNet LSTM (gate order i,f,g,o; final hidden state only) ----
        # Input projection + bias hoisted out of the recurrent loop: one
        # (S*B, I) @ (I, 4H) matmul; the loop body is a single h @ (H, 4H)
        # matmul plus EUP sigmoid/tanh work per timestep.
        xproj = jnp.dot(textf_ref[...], wih_ref[...],
                        preferred_element_type=F32) + lb_ref[...]      # (S*B, 4H)
        whh = whh_ref[...]
        h = jnp.zeros((B, H), F32)
        c = jnp.zeros((B, H), F32)
        for t in range(S):  # S is a small static trip count -> fully unrolled
            gates = xproj[t * B:(t + 1) * B, :] + jnp.dot(h, whh,
                                                          preferred_element_type=F32)
            i = jax.nn.sigmoid(gates[:, 0 * H:1 * H])
            f = jax.nn.sigmoid(gates[:, 1 * H:2 * H])
            g = jnp.tanh(gates[:, 2 * H:3 * H])
            o = jax.nn.sigmoid(gates[:, 3 * H:4 * H])
            c = f * c + i * g
            h = o * jnp.tanh(c)
        text_h = dense(h, wt_ref, bt_ref, relu=False)

        # ---- Tensor fusion ----------------------------------------------------
        # fusion[b, (a*V1+v)*T1+t] = A[b,a]*V[b,v]*T[b,t] built as the elementwise
        # product of three lane-dense (B, K_pad) expansion matmuls; the leading
        # constant 1 of each modality is folded into the additive bias rows
        # ea0/ev0/et0.  Padded columns (729..K_pad) are exactly zero.
        fa = jnp.dot(audio_h, ea_ref[...], preferred_element_type=F32) + ea0_ref[...]
        fv = jnp.dot(video_h, ev_ref[...], preferred_element_type=F32) + ev0_ref[...]
        ft = jnp.dot(text_h, et_ref[...], preferred_element_type=F32) + et0_ref[...]
        fus = fa * fv * ft

        y1 = dense(fus, pf1w_ref, pf1b_ref)                      # pf1 + ReLU
        y2 = dense(y1, pf2w_ref, pf2b_ref)                       # pf2 + ReLU
        y3 = jax.nn.sigmoid(dense(y2, pf3w_ref, pf3b_ref, relu=False))
        out_ref[...] = y3 * out_range + out_shift

    return kernel


# ---------------------------------------------------------------------------
# Parameter construction (deterministic, synthetic)
# ---------------------------------------------------------------------------

def _linear_params(key, in_f, out_f):
    kw, kb = jax.random.split(key)
    w = jax.random.normal(kw, (in_f, out_f), F32) * (1.0 / np.sqrt(in_f))
    b = jax.random.normal(kb, (1, out_f), F32) * 0.01
    return w, b


def _subnet_params(key, in_size, hidden):
    k1, k2, k3 = jax.random.split(key, 3)
    w1, b1 = _linear_params(k1, in_size, hidden)
    w2, b2 = _linear_params(k2, hidden, hidden)
    w3, b3 = _linear_params(k3, hidden, hidden)
    return {"gamma": jnp.ones((1, in_size), F32),
            "beta": jnp.zeros((1, in_size), F32),
            "mean": jnp.zeros((1, in_size), F32),
            "var": jnp.ones((1, in_size), F32),
            "w1": w1, "b1": b1, "w2": w2, "b2": b2, "w3": w3, "b3": b3}


def _lstm_params(key, in_size, hidden):
    kih, khh, kb = jax.random.split(key, 3)
    s = 1.0 / np.sqrt(hidden)
    wih = jax.random.uniform(kih, (in_size, 4 * hidden), F32, -s, s)
    whh = jax.random.uniform(khh, (hidden, 4 * hidden), F32, -s, s)
    b = jax.random.uniform(kb, (1, 4 * hidden), F32, -s, s)   # b_ih + b_hh combined
    return {"wih": wih, "whh": whh, "b": b}


def _fusion_expanders(a1, v1, t1, k_pad):
    """0/1 expansion matrices, lane-padded to k_pad columns (padding is zero)."""
    K = a1 * v1 * t1
    k = np.arange(K)

    def expand(dim, idx):
        m = np.zeros((dim, k_pad), np.float32)
        m[:, :K] = (np.arange(dim)[:, None] == idx[None, :]).astype(np.float32)
        return m

    ea = expand(a1, k // (v1 * t1))
    ev = expand(v1, (k // t1) % v1)
    et = expand(t1, k % t1)
    # Row 0 of each matrix corresponds to the constant 1 prepended to the
    # modality vector; expose it as an additive bias row.
    return (jnp.asarray(ea[0:1]), jnp.asarray(ea[1:]),
            jnp.asarray(ev[0:1]), jnp.asarray(ev[1:]),
            jnp.asarray(et[0:1]), jnp.asarray(et[1:]))


def init_tfn_params(key, input_dims, hidden_dims, text_out, post_fusion_dim):
    audio_in, video_in, text_in = input_dims
    audio_h, video_h, text_h = hidden_dims
    ks = jax.random.split(key, 7)

    fusion_dim = (audio_h + 1) * (video_h + 1) * (text_out + 1)
    fusion_pad = _round_up(fusion_dim, LANE)

    pf1_w, pf1_b = _linear_params(ks[4], fusion_dim, post_fusion_dim)
    pf1_w_pad = jnp.zeros((fusion_pad, post_fusion_dim), F32).at[:fusion_dim].set(pf1_w)

    return {
        "audio": _subnet_params(ks[0], audio_in, audio_h),
        "video": _subnet_params(ks[1], video_in, video_h),
        "lstm": _lstm_params(ks[2], text_in, text_h),
        "text_linear": _linear_params(ks[3], text_h, text_out),
        "pf1": (pf1_w, pf1_b),
        "pf1_pad": pf1_w_pad,
        "pf2": _linear_params(ks[5], post_fusion_dim, post_fusion_dim),
        "pf3": _linear_params(ks[6], post_fusion_dim, 1),
        "output_range": 6.0,
        "output_shift": -3.0,
        "expanders": _fusion_expanders(audio_h + 1, video_h + 1, text_out + 1, fusion_pad),
        "dims": (audio_h, video_h, text_h, text_out, post_fusion_dim),
    }


# ---------------------------------------------------------------------------
# TFN forward (single fused Pallas call)
# ---------------------------------------------------------------------------

def tfn_forward(params, audio_x, video_x, text_x):
    B = audio_x.shape[0]
    S = text_x.shape[1]
    _, _, text_h_dim, _, _ = params["dims"]

    # Fold eval-mode BatchNorm1d into one scale/bias pair per subnet (parameter
    # prep only; done once outside the kernel).
    def bn_fold(p):
        scale = p["gamma"] / jnp.sqrt(p["var"] + BN_EPS)
        return scale, p["beta"] - p["mean"] * scale

    a_scale, a_bias = bn_fold(params["audio"])
    v_scale, v_bias = bn_fold(params["video"])

    # Time-major, flattened text input (S*B, I) so the kernel can hoist the whole
    # LSTM input projection into one matmul.
    text_flat = jnp.transpose(text_x, (1, 0, 2)).reshape(S * B, text_x.shape[2])

    ea0, ea, ev0, ev, et0, et = params["expanders"]
    ap, vp, lp = params["audio"], params["video"], params["lstm"]

    kernel = make_tfn_kernel(S, B, text_h_dim,
                             params["output_range"], params["output_shift"])

    args = (
        audio_x, video_x, text_flat,
        a_scale, a_bias, ap["w1"], ap["b1"], ap["w2"], ap["b2"], ap["w3"], ap["b3"],
        v_scale, v_bias, vp["w1"], vp["b1"], vp["w2"], vp["b2"], vp["w3"], vp["b3"],
        lp["wih"], lp["whh"], lp["b"],
        params["text_linear"][0], params["text_linear"][1],
        ea0, ea, ev0, ev, et0, et,
        params["pf1_pad"], params["pf1"][1],
        params["pf2"][0], params["pf2"][1],
        params["pf3"][0], params["pf3"][1],
    )

    return pl.pallas_call(
        kernel,
        out_shape=jax.ShapeDtypeStruct((B, 1), F32),
        in_specs=[VMEM_SPEC] * len(args),
        out_specs=VMEM_SPEC,
    )(*args)


# ---------------------------------------------------------------------------
# Pure-JAX reference (mirrors the PyTorch forward, eval mode)
# ---------------------------------------------------------------------------

def _ref_subnet(x, p):
    normed = (x - p["mean"]) * p["gamma"] / jnp.sqrt(p["var"] + BN_EPS) + p["beta"]
    y = jax.nn.relu(normed @ p["w1"] + p["b1"])
    y = jax.nn.relu(y @ p["w2"] + p["b2"])
    y = jax.nn.relu(y @ p["w3"] + p["b3"])
    return y


def _ref_lstm(x, p):
    wih, whh, b = p["wih"], p["whh"], p["b"]
    B = x.shape[0]
    H = whh.shape[0]

    def step(carry, xt):
        h, c = carry
        gates = xt @ wih + h @ whh + b
        i = jax.nn.sigmoid(gates[:, 0 * H:1 * H])
        f = jax.nn.sigmoid(gates[:, 1 * H:2 * H])
        g = jnp.tanh(gates[:, 2 * H:3 * H])
        o = jax.nn.sigmoid(gates[:, 3 * H:4 * H])
        c = f * c + i * g
        h = o * jnp.tanh(c)
        return (h, c), None

    (h, _), _ = jax.lax.scan(step, (jnp.zeros((B, H), F32), jnp.zeros((B, H), F32)),
                             jnp.transpose(x, (1, 0, 2)))
    return h


def ref_forward(params, audio_x, video_x, text_x):
    B = audio_x.shape[0]
    audio_h = _ref_subnet(audio_x, params["audio"])
    video_h = _ref_subnet(video_x, params["video"])
    h_n = _ref_lstm(text_x, params["lstm"])
    wt, bt = params["text_linear"]
    text_h = h_n @ wt + bt

    ones = jnp.ones((B, 1), F32)
    a = jnp.concatenate([ones, audio_h], axis=1)
    v = jnp.concatenate([ones, video_h], axis=1)
    t = jnp.concatenate([ones, text_h], axis=1)

    fus = (a[:, :, None] * v[:, None, :]).reshape(B, -1)     # bmm(a.unsq(2), v.unsq(1))
    fus = (fus[:, :, None] * t[:, None, :]).reshape(B, -1)   # bmm(., t.unsq(1))

    w1, b1 = params["pf1"]
    w2, b2 = params["pf2"]
    w3, b3 = params["pf3"]
    y1 = jax.nn.relu(fus @ w1 + b1)
    y2 = jax.nn.relu(y1 @ w2 + b2)
    y3 = jax.nn.sigmoid(y2 @ w3 + b3)
    return y3 * params["output_range"] + params["output_shift"]


# ---------------------------------------------------------------------------

if __name__ == "__main__":
    # Small, deterministic config.
    BATCH = 8
    SEQ = 6
    INPUT_DIMS = (4, 8, 16)      # (audio_in, video_in, text_in)
    HIDDEN_DIMS = (8, 8, 16)     # (audio_hidden, video_hidden, text_hidden)
    TEXT_OUT = 8
    POST_FUSION_DIM = 16

    key = jax.random.PRNGKey(0)
    kp, ka, kv, kt = jax.random.split(key, 4)

    params = init_tfn_params(kp, INPUT_DIMS, HIDDEN_DIMS, TEXT_OUT, POST_FUSION_DIM)

    audio_x = jax.random.normal(ka, (BATCH, INPUT_DIMS[0]), F32)
    video_x = jax.random.normal(kv, (BATCH, INPUT_DIMS[1]), F32)
    text_x = jax.random.normal(kt, (BATCH, SEQ, INPUT_DIMS[2]), F32)

    out = jax.block_until_ready(tfn_forward(params, audio_x, video_x, text_x))
    ref = jax.block_until_ready(ref_forward(params, audio_x, video_x, text_x))
    np.testing.assert_allclose(np.asarray(out), np.asarray(ref), rtol=1e-4, atol=1e-5)

    print("KERNEL_OK")
</pallas_src>

<mosaic_0001>
module attributes {stable_mosaic.version = 11 : i64} {
  func.func @kernel(%arg0: memref<8x4xf32, #tpu.memory_space<vmem>>, %arg1: memref<8x8xf32, #tpu.memory_space<vmem>>, %arg2: memref<48x16xf32, #tpu.memory_space<vmem>>, %arg3: memref<1x4xf32, #tpu.memory_space<vmem>>, %arg4: memref<1x4xf32, #tpu.memory_space<vmem>>, %arg5: memref<4x8xf32, #tpu.memory_space<vmem>>, %arg6: memref<1x8xf32, #tpu.memory_space<vmem>>, %arg7: memref<8x8xf32, #tpu.memory_space<vmem>>, %arg8: memref<1x8xf32, #tpu.memory_space<vmem>>, %arg9: memref<8x8xf32, #tpu.memory_space<vmem>>, %arg10: memref<1x8xf32, #tpu.memory_space<vmem>>, %arg11: memref<1x8xf32, #tpu.memory_space<vmem>>, %arg12: memref<1x8xf32, #tpu.memory_space<vmem>>, %arg13: memref<8x8xf32, #tpu.memory_space<vmem>>, %arg14: memref<1x8xf32, #tpu.memory_space<vmem>>, %arg15: memref<8x8xf32, #tpu.memory_space<vmem>>, %arg16: memref<1x8xf32, #tpu.memory_space<vmem>>, %arg17: memref<8x8xf32, #tpu.memory_space<vmem>>, %arg18: memref<1x8xf32, #tpu.memory_space<vmem>>, %arg19: memref<16x64xf32, #tpu.memory_space<vmem>>, %arg20: memref<16x64xf32, #tpu.memory_space<vmem>>, %arg21: memref<1x64xf32, #tpu.memory_space<vmem>>, %arg22: memref<16x8xf32, #tpu.memory_space<vmem>>, %arg23: memref<1x8xf32, #tpu.memory_space<vmem>>, %arg24: memref<1x768xf32, #tpu.memory_space<vmem>>, %arg25: memref<8x768xf32, #tpu.memory_space<vmem>>, %arg26: memref<1x768xf32, #tpu.memory_space<vmem>>, %arg27: memref<8x768xf32, #tpu.memory_space<vmem>>, %arg28: memref<1x768xf32, #tpu.memory_space<vmem>>, %arg29: memref<8x768xf32, #tpu.memory_space<vmem>>, %arg30: memref<768x16xf32, #tpu.memory_space<vmem>>, %arg31: memref<1x16xf32, #tpu.memory_space<vmem>>, %arg32: memref<16x16xf32, #tpu.memory_space<vmem>>, %arg33: memref<1x16xf32, #tpu.memory_space<vmem>>, %arg34: memref<16x1xf32, #tpu.memory_space<vmem>>, %arg35: memref<1x1xf32, #tpu.memory_space<vmem>>, %arg36: memref<8x1xf32, #tpu.memory_space<vmem>>) attributes {dimension_semantics = [], scalar_prefetch = 0 : i64, scratch_operands = 0 : i64, tpu.core_type = #tpu.core_type<tc>} {
    %c0 = arith.constant 0 : index
    %c0_0 = arith.constant 0 : index
    %0 = vector.load %arg0[%c0, %c0_0] : memref<8x4xf32, #tpu.memory_space<vmem>>, vector<8x4xf32>
    %c0_1 = arith.constant 0 : index
    %c0_2 = arith.constant 0 : index
    %1 = vector.load %arg3[%c0_1, %c0_2] : memref<1x4xf32, #tpu.memory_space<vmem>>, vector<1x4xf32>
    %2 = vector.broadcast %1 : vector<1x4xf32> to vector<8x4xf32>
    %3 = arith.mulf %0, %2 : vector<8x4xf32>
    %c0_3 = arith.constant 0 : index
    %c0_4 = arith.constant 0 : index
    %4 = vector.load %arg4[%c0_3, %c0_4] : memref<1x4xf32, #tpu.memory_space<vmem>>, vector<1x4xf32>
    %5 = vector.broadcast %4 : vector<1x4xf32> to vector<8x4xf32>
    %6 = arith.addf %3, %5 : vector<8x4xf32>
    %c0_5 = arith.constant 0 : index
    %c0_6 = arith.constant 0 : index
    %7 = vector.load %arg5[%c0_5, %c0_6] : memref<4x8xf32, #tpu.memory_space<vmem>>, vector<4x8xf32>
    %cst = arith.constant dense<0.000000e+00> : vector<8x8xf32>
    %8 = tpu.matmul %6, %7, %cst {dimension_numbers = #tpu.dot_dimension_numbers<[1], [0], [0], [1], [0, 0, 1, 1], [], []>} : vector<8x4xf32>, vector<4x8xf32>, vector<8x8xf32> -> vector<8x8xf32>
    %c0_7 = arith.constant 0 : index
    %c0_8 = arith.constant 0 : index
    %9 = vector.load %arg6[%c0_7, %c0_8] : memref<1x8xf32, #tpu.memory_space<vmem>>, vector<1x8xf32>
    %10 = vector.broadcast %9 : vector<1x8xf32> to vector<8x8xf32>
    %11 = arith.addf %8, %10 : vector<8x8xf32>
    %cst_9 = arith.constant 0.000000e+00 : f32
    %12 = vector.broadcast %cst_9 : f32 to vector<8x8xf32>
    %13 = arith.maximumf %11, %12 : vector<8x8xf32>
    %c0_10 = arith.constant 0 : index
    %c0_11 = arith.constant 0 : index
    %14 = vector.load %arg7[%c0_10, %c0_11] : memref<8x8xf32, #tpu.memory_space<vmem>>, vector<8x8xf32>
    %cst_12 = arith.constant dense<0.000000e+00> : vector<8x8xf32>
    %15 = tpu.matmul %13, %14, %cst_12 {dimension_numbers = #tpu.dot_dimension_numbers<[1], [0], [0], [1], [0, 0, 1, 1], [], []>} : vector<8x8xf32>, vector<8x8xf32>, vector<8x8xf32> -> vector<8x8xf32>
    %c0_13 = arith.constant 0 : index
    %c0_14 = arith.constant 0 : index
    %16 = vector.load %arg8[%c0_13, %c0_14] : memref<1x8xf32, #tpu.memory_space<vmem>>, vector<1x8xf32>
    %17 = vector.broadcast %16 : vector<1x8xf32> to vector<8x8xf32>
    %18 = arith.addf %15, %17 : vector<8x8xf32>
    %cst_15 = arith.constant 0.000000e+00 : f32
    %19 = vector.broadcast %cst_15 : f32 to vector<8x8xf32>
    %20 = arith.maximumf %18, %19 : vector<8x8xf32>
    %c0_16 = arith.constant 0 : index
    %c0_17 = arith.constant 0 : index
    %21 = vector.load %arg9[%c0_16, %c0_17] : memref<8x8xf32, #tpu.memory_space<vmem>>, vector<8x8xf32>
    %cst_18 = arith.constant dense<0.000000e+00> : vector<8x8xf32>
    %22 = tpu.matmul %20, %21, %cst_18 {dimension_numbers = #tpu.dot_dimension_numbers<[1], [0], [0], [1], [0, 0, 1, 1], [], []>} : vector<8x8xf32>, vector<8x8xf32>, vector<8x8xf32> -> vector<8x8xf32>
    %c0_19 = arith.constant 0 : index
    %c0_20 = arith.constant 0 : index
    %23 = vector.load %arg10[%c0_19, %c0_20] : memref<1x8xf32, #tpu.memory_space<vmem>>, vector<1x8xf32>
    %24 = vector.broadcast %23 : vector<1x8xf32> to vector<8x8xf32>
    %25 = arith.addf %22, %24 : vector<8x8xf32>
    %cst_21 = arith.constant 0.000000e+00 : f32
    %26 = vector.broadcast %cst_21 : f32 to vector<8x8xf32>
    %27 = arith.maximumf %25, %26 : vector<8x8xf32>
    %c0_22 = arith.constant 0 : index
    %c0_23 = arith.constant 0 : index
    %28 = vector.load %arg1[%c0_22, %c0_23] : memref<8x8xf32, #tpu.memory_space<vmem>>, vector<8x8xf32>
    %c0_24 = arith.constant 0 : index
    %c0_25 = arith.constant 0 : index
    %29 = vector.load %arg11[%c0_24, %c0_25] : memref<1x8xf32, #tpu.memory_space<vmem>>, vector<1x8xf32>
    %30 = vector.broadcast %29 : vector<1x8xf32> to vector<8x8xf32>
    %31 = arith.mulf %28, %30 : vector<8x8xf32>
    %c0_26 = arith.constant 0 : index
    %c0_27 = arith.constant 0 : index
    %32 = vector.load %arg12[%c0_26, %c0_27] : memref<1x8xf32, #tpu.memory_space<vmem>>, vector<1x8xf32>
    %33 = vector.broadcast %32 : vector<1x8xf32> to vector<8x8xf32>
    %34 = arith.addf %31, %33 : vector<8x8xf32>
    %c0_28 = arith.constant 0 : index
    %c0_29 = arith.constant 0 : index
    %35 = vector.load %arg13[%c0_28, %c0_29] : memref<8x8xf32, #tpu.memory_space<vmem>>, vector<8x8xf32>
    %cst_30 = arith.constant dense<0.000000e+00> : vector<8x8xf32>
    %36 = tpu.matmul %34, %35, %cst_30 {dimension_numbers = #tpu.dot_dimension_numbers<[1], [0], [0], [1], [0, 0, 1, 1], [], []>} : vector<8x8xf32>, vector<8x8xf32>, vector<8x8xf32> -> vector<8x8xf32>
    %c0_31 = arith.constant 0 : index
    %c0_32 = arith.constant 0 : index
    %37 = vector.load %arg14[%c0_31, %c0_32] : memref<1x8xf32, #tpu.memory_space<vmem>>, vector<1x8xf32>
    %38 = vector.broadcast %37 : vector<1x8xf32> to vector<8x8xf32>
    %39 = arith.addf %36, %38 : vector<8x8xf32>
    %cst_33 = arith.constant 0.000000e+00 : f32
    %40 = vector.broadcast %cst_33 : f32 to vector<8x8xf32>
    %41 = arith.maximumf %39, %40 : vector<8x8xf32>
    %c0_34 = arith.constant 0 : index
    %c0_35 = arith.constant 0 : index
    %42 = vector.load %arg15[%c0_34, %c0_35] : memref<8x8xf32, #tpu.memory_space<vmem>>, vector<8x8xf32>
    %cst_36 = arith.constant dense<0.000000e+00> : vector<8x8xf32>
    %43 = tpu.matmul %41, %42, %cst_36 {dimension_numbers = #tpu.dot_dimension_numbers<[1], [0], [0], [1], [0, 0, 1, 1], [], []>} : vector<8x8xf32>, vector<8x8xf32>, vector<8x8xf32> -> vector<8x8xf32>
    %c0_37 = arith.constant 0 : index
    %c0_38 = arith.constant 0 : index
    %44 = vector.load %arg16[%c0_37, %c0_38] : memref<1x8xf32, #tpu.memory_space<vmem>>, vector<1x8xf32>
    %45 = vector.broadcast %44 : vector<1x8xf32> to vector<8x8xf32>
    %46 = arith.addf %43, %45 : vector<8x8xf32>
    %cst_39 = arith.constant 0.000000e+00 : f32
    %47 = vector.broadcast %cst_39 : f32 to vector<8x8xf32>
    %48 = arith.maximumf %46, %47 : vector<8x8xf32>
    %c0_40 = arith.constant 0 : index
    %c0_41 = arith.constant 0 : index
    %49 = vector.load %arg17[%c0_40, %c0_41] : memref<8x8xf32, #tpu.memory_space<vmem>>, vector<8x8xf32>
    %cst_42 = arith.constant dense<0.000000e+00> : vector<8x8xf32>
    %50 = tpu.matmul %48, %49, %cst_42 {dimension_numbers = #tpu.dot_dimension_numbers<[1], [0], [0], [1], [0, 0, 1, 1], [], []>} : vector<8x8xf32>, vector<8x8xf32>, vector<8x8xf32> -> vector<8x8xf32>
    %c0_43 = arith.constant 0 : index
    %c0_44 = arith.constant 0 : index
    %51 = vector.load %arg18[%c0_43, %c0_44] : memref<1x8xf32, #tpu.memory_space<vmem>>, vector<1x8xf32>
    %52 = vector.broadcast %51 : vector<1x8xf32> to vector<8x8xf32>
    %53 = arith.addf %50, %52 : vector<8x8xf32>
    %cst_45 = arith.constant 0.000000e+00 : f32
    %54 = vector.broadcast %cst_45 : f32 to vector<8x8xf32>
    %55 = arith.maximumf %53, %54 : vector<8x8xf32>
    %c0_46 = arith.constant 0 : index
    %c0_47 = arith.constant 0 : index
    %56 = vector.load %arg2[%c0_46, %c0_47] : memref<48x16xf32, #tpu.memory_space<vmem>>, vector<48x16xf32>
    %c0_48 = arith.constant 0 : index
    %c0_49 = arith.constant 0 : index
    %57 = vector.load %arg19[%c0_48, %c0_49] : memref<16x64xf32, #tpu.memory_space<vmem>>, vector<16x64xf32>
    %cst_50 = arith.constant dense<0.000000e+00> : vector<48x64xf32>
    %58 = tpu.matmul %56, %57, %cst_50 {dimension_numbers = #tpu.dot_dimension_numbers<[1], [0], [0], [1], [0, 0, 1, 1], [], []>} : vector<48x16xf32>, vector<16x64xf32>, vector<48x64xf32> -> vector<48x64xf32>
    %c0_51 = arith.constant 0 : index
    %c0_52 = arith.constant 0 : index
    %59 = vector.load %arg21[%c0_51, %c0_52] : memref<1x64xf32, #tpu.memory_space<vmem>>, vector<1x64xf32>
    %60 = vector.broadcast %59 : vector<1x64xf32> to vector<48x64xf32>
    %61 = arith.addf %58, %60 : vector<48x64xf32>
    %c0_53 = arith.constant 0 : index
    %c0_54 = arith.constant 0 : index
    %62 = vector.load %arg20[%c0_53, %c0_54] : memref<16x64xf32, #tpu.memory_space<vmem>>, vector<16x64xf32>
    %cst_55 = arith.constant 0.000000e+00 : f32
    %63 = vector.broadcast %cst_55 : f32 to vector<8x16xf32>
    %cst_56 = arith.constant 0.000000e+00 : f32
    %64 = vector.broadcast %cst_56 : f32 to vector<8x16xf32>
    %65 = vector.extract_strided_slice %61 {offsets = [0, 0], sizes = [8, 64], strides = [1, 1]} : vector<48x64xf32> to vector<8x64xf32>
    %cst_57 = arith.constant dense<0.000000e+00> : vector<8x64xf32>
    %66 = tpu.matmul %63, %62, %cst_57 {dimension_numbers = #tpu.dot_dimension_numbers<[1], [0], [0], [1], [0, 0, 1, 1], [], []>} : vector<8x16xf32>, vector<16x64xf32>, vector<8x64xf32> -> vector<8x64xf32>
    %67 = arith.addf %65, %66 : vector<8x64xf32>
    %68 = vector.extract_strided_slice %67 {offsets = [0, 0], sizes = [8, 16], strides = [1, 1]} : vector<8x64xf32> to vector<8x16xf32>
    %69 = arith.negf %68 : vector<8x16xf32>
    %70 = math.exp %69 : vector<8x16xf32>
    %cst_58 = arith.constant 1.000000e+00 : f32
    %71 = vector.broadcast %cst_58 : f32 to vector<8x16xf32>
    %72 = arith.addf %71, %70 : vector<8x16xf32>
    %73 = arith.divf %71, %72 : vector<8x16xf32>
    %74 = vector.extract_strided_slice %67 {offsets = [0, 16], sizes = [8, 16], strides = [1, 1]} : vector<8x64xf32> to vector<8x16xf32>
    %75 = arith.negf %74 : vector<8x16xf32>
    %76 = math.exp %75 : vector<8x16xf32>
    %cst_59 = arith.constant 1.000000e+00 : f32
    %77 = vector.broadcast %cst_59 : f32 to vector<8x16xf32>
    %78 = arith.addf %77, %76 : vector<8x16xf32>
    %79 = arith.divf %77, %78 : vector<8x16xf32>
    %80 = vector.extract_strided_slice %67 {offsets = [0, 32], sizes = [8, 16], strides = [1, 1]} : vector<8x64xf32> to vector<8x16xf32>
    %81 = math.tanh %80 : vector<8x16xf32>
    %82 = vector.extract_strided_slice %67 {offsets = [0, 48], sizes = [8, 16], strides = [1, 1]} : vector<8x64xf32> to vector<8x16xf32>
    %83 = arith.negf %82 : vector<8x16xf32>
    %84 = math.exp %83 : vector<8x16xf32>
    %cst_60 = arith.constant 1.000000e+00 : f32
    %85 = vector.broadcast %cst_60 : f32 to vector<8x16xf32>
    %86 = arith.addf %85, %84 : vector<8x16xf32>
    %87 = arith.divf %85, %86 : vector<8x16xf32>
    %88 = arith.mulf %79, %64 : vector<8x16xf32>
    %89 = arith.mulf %73, %81 : vector<8x16xf32>
    %90 = arith.addf %88, %89 : vector<8x16xf32>
    %91 = math.tanh %90 : vector<8x16xf32>
    %92 = arith.mulf %87, %91 : vector<8x16xf32>
    %93 = vector.extract_strided_slice %61 {offsets = [8, 0], sizes = [8, 64], strides = [1, 1]} : vector<48x64xf32> to vector<8x64xf32>
    %cst_61 = arith.constant dense<0.000000e+00> : vector<8x64xf32>
    %94 = tpu.matmul %92, %62, %cst_61 {dimension_numbers = #tpu.dot_dimension_numbers<[1], [0], [0], [1], [0, 0, 1, 1], [], []>} : vector<8x16xf32>, vector<16x64xf32>, vector<8x64xf32> -> vector<8x64xf32>
    %95 = arith.addf %93, %94 : vector<8x64xf32>
    %96 = vector.extract_strided_slice %95 {offsets = [0, 0], sizes = [8, 16], strides = [1, 1]} : vector<8x64xf32> to vector<8x16xf32>
    %97 = arith.negf %96 : vector<8x16xf32>
    %98 = math.exp %97 : vector<8x16xf32>
    %cst_62 = arith.constant 1.000000e+00 : f32
    %99 = vector.broadcast %cst_62 : f32 to vector<8x16xf32>
    %100 = arith.addf %99, %98 : vector<8x16xf32>
    %101 = arith.divf %99, %100 : vector<8x16xf32>
    %102 = vector.extract_strided_slice %95 {offsets = [0, 16], sizes = [8, 16], strides = [1, 1]} : vector<8x64xf32> to vector<8x16xf32>
    %103 = arith.negf %102 : vector<8x16xf32>
    %104 = math.exp %103 : vector<8x16xf32>
    %cst_63 = arith.constant 1.000000e+00 : f32
    %105 = vector.broadcast %cst_63 : f32 to vector<8x16xf32>
    %106 = arith.addf %105, %104 : vector<8x16xf32>
    %107 = arith.divf %105, %106 : vector<8x16xf32>
    %108 = vector.extract_strided_slice %95 {offsets = [0, 32], sizes = [8, 16], strides = [1, 1]} : vector<8x64xf32> to vector<8x16xf32>
    %109 = math.tanh %108 : vector<8x16xf32>
    %110 = vector.extract_strided_slice %95 {offsets = [0, 48], sizes = [8, 16], strides = [1, 1]} : vector<8x64xf32> to vector<8x16xf32>
    %111 = arith.negf %110 : vector<8x16xf32>
    %112 = math.exp %111 : vector<8x16xf32>
    %cst_64 = arith.constant 1.000000e+00 : f32
    %113 = vector.broadcast %cst_64 : f32 to vector<8x16xf32>
    %114 = arith.addf %113, %112 : vector<8x16xf32>
    %115 = arith.divf %113, %114 : vector<8x16xf32>
    %116 = arith.mulf %107, %90 : vector<8x16xf32>
    %117 = arith.mulf %101, %109 : vector<8x16xf32>
    %118 = arith.addf %116, %117 : vector<8x16xf32>
    %119 = math.tanh %118 : vector<8x16xf32>
    %120 = arith.mulf %115, %119 : vector<8x16xf32>
    %121 = vector.extract_strided_slice %61 {offsets = [16, 0], sizes = [8, 64], strides = [1, 1]} : vector<48x64xf32> to vector<8x64xf32>
    %cst_65 = arith.constant dense<0.000000e+00> : vector<8x64xf32>
    %122 = tpu.matmul %120, %62, %cst_65 {dimension_numbers = #tpu.dot_dimension_numbers<[1], [0], [0], [1], [0, 0, 1, 1], [], []>} : vector<8x16xf32>, vector<16x64xf32>, vector<8x64xf32> -> vector<8x64xf32>
    %123 = arith.addf %121, %122 : vector<8x64xf32>
    %124 = vector.extract_strided_slice %123 {offsets = [0, 0], sizes = [8, 16], strides = [1, 1]} : vector<8x64xf32> to vector<8x16xf32>
    %125 = arith.negf %124 : vector<8x16xf32>
    %126 = math.exp %125 : vector<8x16xf32>
    %cst_66 = arith.constant 1.000000e+00 : f32
    %127 = vector.broadcast %cst_66 : f32 to vector<8x16xf32>
    %128 = arith.addf %127, %126 : vector<8x16xf32>
    %129 = arith.divf %127, %128 : vector<8x16xf32>
    %130 = vector.extract_strided_slice %123 {offsets = [0, 16], sizes = [8, 16], strides = [1, 1]} : vector<8x64xf32> to vector<8x16xf32>
    %131 = arith.negf %130 : vector<8x16xf32>
    %132 = math.exp %131 : vector<8x16xf32>
    %cst_67 = arith.constant 1.000000e+00 : f32
    %133 = vector.broadcast %cst_67 : f32 to vector<8x16xf32>
    %134 = arith.addf %133, %132 : vector<8x16xf32>
    %135 = arith.divf %133, %134 : vector<8x16xf32>
    %136 = vector.extract_strided_slice %123 {offsets = [0, 32], sizes = [8, 16], strides = [1, 1]} : vector<8x64xf32> to vector<8x16xf32>
    %137 = math.tanh %136 : vector<8x16xf32>
    %138 = vector.extract_strided_slice %123 {offsets = [0, 48], sizes = [8, 16], strides = [1, 1]} : vector<8x64xf32> to vector<8x16xf32>
    %139 = arith.negf %138 : vector<8x16xf32>
    %140 = math.exp %139 : vector<8x16xf32>
    %cst_68 = arith.constant 1.000000e+00 : f32
    %141 = vector.broadcast %cst_68 : f32 to vector<8x16xf32>
    %142 = arith.addf %141, %140 : vector<8x16xf32>
    %143 = arith.divf %141, %142 : vector<8x16xf32>
    %144 = arith.mulf %135, %118 : vector<8x16xf32>
    %145 = arith.mulf %129, %137 : vector<8x16xf32>
    %146 = arith.addf %144, %145 : vector<8x16xf32>
    %147 = math.tanh %146 : vector<8x16xf32>
    %148 = arith.mulf %143, %147 : vector<8x16xf32>
    %149 = vector.extract_strided_slice %61 {offsets = [24, 0], sizes = [8, 64], strides = [1, 1]} : vector<48x64xf32> to vector<8x64xf32>
    %cst_69 = arith.constant dense<0.000000e+00> : vector<8x64xf32>
    %150 = tpu.matmul %148, %62, %cst_69 {dimension_numbers = #tpu.dot_dimension_numbers<[1], [0], [0], [1], [0, 0, 1, 1], [], []>} : vector<8x16xf32>, vector<16x64xf32>, vector<8x64xf32> -> vector<8x64xf32>
    %151 = arith.addf %149, %150 : vector<8x64xf32>
    %152 = vector.extract_strided_slice %151 {offsets = [0, 0], sizes = [8, 16], strides = [1, 1]} : vector<8x64xf32> to vector<8x16xf32>
    %153 = arith.negf %152 : vector<8x16xf32>
    %154 = math.exp %153 : vector<8x16xf32>
    %cst_70 = arith.constant 1.000000e+00 : f32
    %155 = vector.broadcast %cst_70 : f32 to vector<8x16xf32>
    %156 = arith.addf %155, %154 : vector<8x16xf32>
    %157 = arith.divf %155, %156 : vector<8x16xf32>
    %158 = vector.extract_strided_slice %151 {offsets = [0, 16], sizes = [8, 16], strides = [1, 1]} : vector<8x64xf32> to vector<8x16xf32>
    %159 = arith.negf %158 : vector<8x16xf32>
    %160 = math.exp %159 : vector<8x16xf32>
    %cst_71 = arith.constant 1.000000e+00 : f32
    %161 = vector.broadcast %cst_71 : f32 to vector<8x16xf32>
    %162 = arith.addf %161, %160 : vector<8x16xf32>
    %163 = arith.divf %161, %162 : vector<8x16xf32>
    %164 = vector.extract_strided_slice %151 {offsets = [0, 32], sizes = [8, 16], strides = [1, 1]} : vector<8x64xf32> to vector<8x16xf32>
    %165 = math.tanh %164 : vector<8x16xf32>
    %166 = vector.extract_strided_slice %151 {offsets = [0, 48], sizes = [8, 16], strides = [1, 1]} : vector<8x64xf32> to vector<8x16xf32>
    %167 = arith.negf %166 : vector<8x16xf32>
    %168 = math.exp %167 : vector<8x16xf32>
    %cst_72 = arith.constant 1.000000e+00 : f32
    %169 = vector.broadcast %cst_72 : f32 to vector<8x16xf32>
    %170 = arith.addf %169, %168 : vector<8x16xf32>
    %171 = arith.divf %169, %170 : vector<8x16xf32>
    %172 = arith.mulf %163, %146 : vector<8x16xf32>
    %173 = arith.mulf %157, %165 : vector<8x16xf32>
    %174 = arith.addf %172, %173 : vector<8x16xf32>
    %175 = math.tanh %174 : vector<8x16xf32>
    %176 = arith.mulf %171, %175 : vector<8x16xf32>
    %177 = vector.extract_strided_slice %61 {offsets = [32, 0], sizes = [8, 64], strides = [1, 1]} : vector<48x64xf32> to vector<8x64xf32>
    %cst_73 = arith.constant dense<0.000000e+00> : vector<8x64xf32>
    %178 = tpu.matmul %176, %62, %cst_73 {dimension_numbers = #tpu.dot_dimension_numbers<[1], [0], [0], [1], [0, 0, 1, 1], [], []>} : vector<8x16xf32>, vector<16x64xf32>, vector<8x64xf32> -> vector<8x64xf32>
    %179 = arith.addf %177, %178 : vector<8x64xf32>
    %180 = vector.extract_strided_slice %179 {offsets = [0, 0], sizes = [8, 16], strides = [1, 1]} : vector<8x64xf32> to vector<8x16xf32>
    %181 = arith.negf %180 : vector<8x16xf32>
    %182 = math.exp %181 : vector<8x16xf32>
    %cst_74 = arith.constant 1.000000e+00 : f32
    %183 = vector.broadcast %cst_74 : f32 to vector<8x16xf32>
    %184 = arith.addf %183, %182 : vector<8x16xf32>
    %185 = arith.divf %183, %184 : vector<8x16xf32>
    %186 = vector.extract_strided_slice %179 {offsets = [0, 16], sizes = [8, 16], strides = [1, 1]} : vector<8x64xf32> to vector<8x16xf32>
    %187 = arith.negf %186 : vector<8x16xf32>
    %188 = math.exp %187 : vector<8x16xf32>
    %cst_75 = arith.constant 1.000000e+00 : f32
    %189 = vector.broadcast %cst_75 : f32 to vector<8x16xf32>
    %190 = arith.addf %189, %188 : vector<8x16xf32>
    %191 = arith.divf %189, %190 : vector<8x16xf32>
    %192 = vector.extract_strided_slice %179 {offsets = [0, 32], sizes = [8, 16], strides = [1, 1]} : vector<8x64xf32> to vector<8x16xf32>
    %193 = math.tanh %192 : vector<8x16xf32>
    %194 = vector.extract_strided_slice %179 {offsets = [0, 48], sizes = [8, 16], strides = [1, 1]} : vector<8x64xf32> to vector<8x16xf32>
    %195 = arith.negf %194 : vector<8x16xf32>
    %196 = math.exp %195 : vector<8x16xf32>
    %cst_76 = arith.constant 1.000000e+00 : f32
    %197 = vector.broadcast %cst_76 : f32 to vector<8x16xf32>
    %198 = arith.addf %197, %196 : vector<8x16xf32>
    %199 = arith.divf %197, %198 : vector<8x16xf32>
    %200 = arith.mulf %191, %174 : vector<8x16xf32>
    %201 = arith.mulf %185, %193 : vector<8x16xf32>
    %202 = arith.addf %200, %201 : vector<8x16xf32>
    %203 = math.tanh %202 : vector<8x16xf32>
    %204 = arith.mulf %199, %203 : vector<8x16xf32>
    %205 = vector.extract_strided_slice %61 {offsets = [40, 0], sizes = [8, 64], strides = [1, 1]} : vector<48x64xf32> to vector<8x64xf32>
    %cst_77 = arith.constant dense<0.000000e+00> : vector<8x64xf32>
    %206 = tpu.matmul %204, %62, %cst_77 {dimension_numbers = #tpu.dot_dimension_numbers<[1], [0], [0], [1], [0, 0, 1, 1], [], []>} : vector<8x16xf32>, vector<16x64xf32>, vector<8x64xf32> -> vector<8x64xf32>
    %207 = arith.addf %205, %206 : vector<8x64xf32>
    %208 = vector.extract_strided_slice %207 {offsets = [0, 0], sizes = [8, 16], strides = [1, 1]} : vector<8x64xf32> to vector<8x16xf32>
    %209 = arith.negf %208 : vector<8x16xf32>
    %210 = math.exp %209 : vector<8x16xf32>
    %cst_78 = arith.constant 1.000000e+00 : f32
    %211 = vector.broadcast %cst_78 : f32 to vector<8x16xf32>
    %212 = arith.addf %211, %210 : vector<8x16xf32>
    %213 = arith.divf %211, %212 : vector<8x16xf32>
    %214 = vector.extract_strided_slice %207 {offsets = [0, 16], sizes = [8, 16], strides = [1, 1]} : vector<8x64xf32> to vector<8x16xf32>
    %215 = arith.negf %214 : vector<8x16xf32>
    %216 = math.exp %215 : vector<8x16xf32>
    %cst_79 = arith.constant 1.000000e+00 : f32
    %217 = vector.broadcast %cst_79 : f32 to vector<8x16xf32>
    %218 = arith.addf %217, %216 : vector<8x16xf32>
    %219 = arith.divf %217, %218 : vector<8x16xf32>
    %220 = vector.extract_strided_slice %207 {offsets = [0, 32], sizes = [8, 16], strides = [1, 1]} : vector<8x64xf32> to vector<8x16xf32>
    %221 = math.tanh %220 : vector<8x16xf32>
    %222 = vector.extract_strided_slice %207 {offsets = [0, 48], sizes = [8, 16], strides = [1, 1]} : vector<8x64xf32> to vector<8x16xf32>
    %223 = arith.negf %222 : vector<8x16xf32>
    %224 = math.exp %223 : vector<8x16xf32>
    %cst_80 = arith.constant 1.000000e+00 : f32
    %225 = vector.broadcast %cst_80 : f32 to vector<8x16xf32>
    %226 = arith.addf %225, %224 : vector<8x16xf32>
    %227 = arith.divf %225, %226 : vector<8x16xf32>
    %228 = arith.mulf %219, %202 : vector<8x16xf32>
    %229 = arith.mulf %213, %221 : vector<8x16xf32>
    %230 = arith.addf %228, %229 : vector<8x16xf32>
    %231 = math.tanh %230 : vector<8x16xf32>
    %232 = arith.mulf %227, %231 : vector<8x16xf32>
    %c0_81 = arith.constant 0 : index
    %c0_82 = arith.constant 0 : index
    %233 = vector.load %arg22[%c0_81, %c0_82] : memref<16x8xf32, #tpu.memory_space<vmem>>, vector<16x8xf32>
    %cst_83 = arith.constant dense<0.000000e+00> : vector<8x8xf32>
    %234 = tpu.matmul %232, %233, %cst_83 {dimension_numbers = #tpu.dot_dimension_numbers<[1], [0], [0], [1], [0, 0, 1, 1], [], []>} : vector<8x16xf32>, vector<16x8xf32>, vector<8x8xf32> -> vector<8x8xf32>
    %c0_84 = arith.constant 0 : index
    %c0_85 = arith.constant 0 : index
    %235 = vector.load %arg23[%c0_84, %c0_85] : memref<1x8xf32, #tpu.memory_space<vmem>>, vector<1x8xf32>
    %236 = vector.broadcast %235 : vector<1x8xf32> to vector<8x8xf32>
    %237 = arith.addf %234, %236 : vector<8x8xf32>
    %c0_86 = arith.constant 0 : index
    %c0_87 = arith.constant 0 : index
    %238 = vector.load %arg25[%c0_86, %c0_87] : memref<8x768xf32, #tpu.memory_space<vmem>>, vector<8x768xf32>
    %cst_88 = arith.constant dense<0.000000e+00> : vector<8x768xf32>
    %239 = tpu.matmul %27, %238, %cst_88 {dimension_numbers = #tpu.dot_dimension_numbers<[1], [0], [0], [1], [0, 0, 1, 1], [], []>} : vector<8x8xf32>, vector<8x768xf32>, vector<8x768xf32> -> vector<8x768xf32>
    %c0_89 = arith.constant 0 : index
    %c0_90 = arith.constant 0 : index
    %240 = vector.load %arg24[%c0_89, %c0_90] : memref<1x768xf32, #tpu.memory_space<vmem>>, vector<1x768xf32>
    %241 = vector.broadcast %240 : vector<1x768xf32> to vector<8x768xf32>
    %242 = arith.addf %239, %241 : vector<8x768xf32>
    %c0_91 = arith.constant 0 : index
    %c0_92 = arith.constant 0 : index
    %243 = vector.load %arg27[%c0_91, %c0_92] : memref<8x768xf32, #tpu.memory_space<vmem>>, vector<8x768xf32>
    %cst_93 = arith.constant dense<0.000000e+00> : vector<8x768xf32>
    %244 = tpu.matmul %55, %243, %cst_93 {dimension_numbers = #tpu.dot_dimension_numbers<[1], [0], [0], [1], [0, 0, 1, 1], [], []>} : vector<8x8xf32>, vector<8x768xf32>, vector<8x768xf32> -> vector<8x768xf32>
    %c0_94 = arith.constant 0 : index
    %c0_95 = arith.constant 0 : index
    %245 = vector.load %arg26[%c0_94, %c0_95] : memref<1x768xf32, #tpu.memory_space<vmem>>, vector<1x768xf32>
    %246 = vector.broadcast %245 : vector<1x768xf32> to vector<8x768xf32>
    %247 = arith.addf %244, %246 : vector<8x768xf32>
    %c0_96 = arith.constant 0 : index
    %c0_97 = arith.constant 0 : index
    %248 = vector.load %arg29[%c0_96, %c0_97] : memref<8x768xf32, #tpu.memory_space<vmem>>, vector<8x768xf32>
    %cst_98 = arith.constant dense<0.000000e+00> : vector<8x768xf32>
    %249 = tpu.matmul %237, %248, %cst_98 {dimension_numbers = #tpu.dot_dimension_numbers<[1], [0], [0], [1], [0, 0, 1, 1], [], []>} : vector<8x8xf32>, vector<8x768xf32>, vector<8x768xf32> -> vector<8x768xf32>
    %c0_99 = arith.constant 0 : index
    %c0_100 = arith.constant 0 : index
    %250 = vector.load %arg28[%c0_99, %c0_100] : memref<1x768xf32, #tpu.memory_space<vmem>>, vector<1x768xf32>
    %251 = vector.broadcast %250 : vector<1x768xf32> to vector<8x768xf32>
    %252 = arith.addf %249, %251 : vector<8x768xf32>
    %253 = arith.mulf %242, %247 : vector<8x768xf32>
    %254 = arith.mulf %253, %252 : vector<8x768xf32>
    %c0_101 = arith.constant 0 : index
    %c0_102 = arith.constant 0 : index
    %255 = vector.load %arg30[%c0_101, %c0_102] : memref<768x16xf32, #tpu.memory_space<vmem>>, vector<768x16xf32>
    %cst_103 = arith.constant dense<0.000000e+00> : vector<8x16xf32>
    %256 = tpu.matmul %254, %255, %cst_103 {dimension_numbers = #tpu.dot_dimension_numbers<[1], [0], [0], [1], [0, 0, 1, 1], [], []>} : vector<8x768xf32>, vector<768x16xf32>, vector<8x16xf32> -> vector<8x16xf32>
    %c0_104 = arith.constant 0 : index
    %c0_105 = arith.constant 0 : index
    %257 = vector.load %arg31[%c0_104, %c0_105] : memref<1x16xf32, #tpu.memory_space<vmem>>, vector<1x16xf32>
    %258 = vector.broadcast %257 : vector<1x16xf32> to vector<8x16xf32>
    %259 = arith.addf %256, %258 : vector<8x16xf32>
    %cst_106 = arith.constant 0.000000e+00 : f32
    %260 = vector.broadcast %cst_106 : f32 to vector<8x16xf32>
    %261 = arith.maximumf %259, %260 : vector<8x16xf32>
    %c0_107 = arith.constant 0 : index
    %c0_108 = arith.constant 0 : index
    %262 = vector.load %arg32[%c0_107, %c0_108] : memref<16x16xf32, #tpu.memory_space<vmem>>, vector<16x16xf32>
    %cst_109 = arith.constant dense<0.000000e+00> : vector<8x16xf32>
    %263 = tpu.matmul %261, %262, %cst_109 {dimension_numbers = #tpu.dot_dimension_numbers<[1], [0], [0], [1], [0, 0, 1, 1], [], []>} : vector<8x16xf32>, vector<16x16xf32>, vector<8x16xf32> -> vector<8x16xf32>
    %c0_110 = arith.constant 0 : index
    %c0_111 = arith.constant 0 : index
    %264 = vector.load %arg33[%c0_110, %c0_111] : memref<1x16xf32, #tpu.memory_space<vmem>>, vector<1x16xf32>
    %265 = vector.broadcast %264 : vector<1x16xf32> to vector<8x16xf32>
    %266 = arith.addf %263, %265 : vector<8x16xf32>
    %cst_112 = arith.constant 0.000000e+00 : f32
    %267 = vector.broadcast %cst_112 : f32 to vector<8x16xf32>
    %268 = arith.maximumf %266, %267 : vector<8x16xf32>
    %c0_113 = arith.constant 0 : index
    %c0_114 = arith.constant 0 : index
    %269 = vector.load %arg34[%c0_113, %c0_114] : memref<16x1xf32, #tpu.memory_space<vmem>>, vector<16x1xf32>
    %cst_115 = arith.constant dense<0.000000e+00> : vector<8x1xf32>
    %270 = tpu.matmul %268, %269, %cst_115 {dimension_numbers = #tpu.dot_dimension_numbers<[1], [0], [0], [1], [0, 0, 1, 1], [], []>} : vector<8x16xf32>, vector<16x1xf32>, vector<8x1xf32> -> vector<8x1xf32>
    %c0_116 = arith.constant 0 : index
    %c0_117 = arith.constant 0 : index
    %271 = vector.load %arg35[%c0_116, %c0_117] : memref<1x1xf32, #tpu.memory_space<vmem>>, vector<1x1xf32>
    %272 = vector.broadcast %271 : vector<1x1xf32> to vector<8x1xf32>
    %273 = arith.addf %270, %272 : vector<8x1xf32>
    %274 = arith.negf %273 : vector<8x1xf32>
    %275 = math.exp %274 : vector<8x1xf32>
    %cst_118 = arith.constant 1.000000e+00 : f32
    %276 = vector.broadcast %cst_118 : f32 to vector<8x1xf32>
    %277 = arith.addf %276, %275 : vector<8x1xf32>
    %278 = arith.divf %276, %277 : vector<8x1xf32>
    %cst_119 = arith.constant 6.000000e+00 : f32
    %279 = vector.broadcast %cst_119 : f32 to vector<8x1xf32>
    %280 = arith.mulf %278, %279 : vector<8x1xf32>
    %cst_120 = arith.constant -3.000000e+00 : f32
    %281 = vector.broadcast %cst_120 : f32 to vector<8x1xf32>
    %282 = arith.addf %280, %281 : vector<8x1xf32>
    %c0_121 = arith.constant 0 : index
    %c0_122 = arith.constant 0 : index
    %283 = vector.load %arg36[%c0_121, %c0_122] : memref<8x1xf32, #tpu.memory_space<vmem>>, vector<8x1xf32>
    tpu.vector_store %arg36[%c0_121, %c0_122], %282 {strides = array<i32>} : memref<8x1xf32, #tpu.memory_space<vmem>>, vector<8x1xf32>,
    return
  }
}

</mosaic_0001>

<bundles_post_ra>
// kernel: tpu_custom_call.1
= control target key start
LH: loop header
LB: loop body
LE: loop exit
PB: predicated region body
PF: predicated region fallthrough
CT: control target
= control target key end

     0   :  { %v3330_v0 = vmov 0.0   ;;  %s3331_s3 = smov 5   ;;  %vm3332_vm0 = vmmov 0   ;;  %s3333_s10 = smov 3   ;;  %vm181_vm1 = vcmask 1043456   ;;  %vm177_vm2 = vcmask 31744   ;;  %s3847_s0 = inlined_call_operand.smem [shape: u32[37], index: -1, kind: input, shape index: {}] }
   0x1   :  { %3004 = vmatprep.subr.mxu0 %v3330_v0  ;;  %s2768_s6 = sld [smem:[%s3847_s0 + %s3331_s3]]   ;;  %3006 = vmatprep.mubr.msk.f32.mxu0 %vm3332_vm0, %v3330_v0  ;;  %s3334_s14 = smov 4   ;;  %vm264_vm3 = vcmask 64512   ;;  %vm699_vm4 = vcmask 130048   ;;  %v3349_v39 = vmov 0.0|0.0   ;;  %vm2758_vm5 = vcmask 7168  }
   0x2   :  { %s1_s9 = sld [smem:[%s3847_s0]]   ;;  %3029 = vmatprep.subr.mxu1 %v3330_v0  ;;  %3031 = vmatprep.mubr.msk.f32.mxu1 %vm3332_vm0, %v3330_v0  ;;  %s3335_s18 = smov 7  }
   0x3   :  { %s2766_s13 = sld [smem:[%s3847_s0 + %s3333_s10]]   ;;  %s3336_s22 = smov 6  }
   0x4   :  { %s2767_s17 = sld [smem:[%s3847_s0 + %s3334_s14]]   ;;  %s3337_s26 = smov 9  }
   0x5   :  { %s2770_s21 = sld [smem:[%s3847_s0 + %s3335_s18]]   ;;  %s3338_s30 = smov 8  }
   0x6   :  { %s2769_s25 = sld [smem:[%s3847_s0 + %s3336_s22]]   ;;  %s3339_s4 = smov 1  }
   0x7   :  { %v169_v1 = vld [vmem:[%s2768_s6] sm:$0xf]  ;;  %s2772_s29 = sld [smem:[%s3847_s0 + %s3337_s26]]   ;;  %s3340_s8 = smov 11  }
   0x8   :  { %v152_v2 = vld [vmem:[%s1_s9] sm:$0xff]  ;;  %3005 = vmatpush3.msk.msra.mxu0 %vm181_vm1, %v169_v1  ;;  %s2771_s3 = sld [smem:[%s3847_s0 + %s3338_s30]]   ;;  %s3341_s12 = smov 12  }
   0x9   :  { %v2800_v3 = vld [vmem:[%s2766_s13] ss:$0 sm:$0xff]  ;;  %3009 = vmatprep.subr.mxu0 %v3330_v0  ;;  %s2764_s7 = sld [smem:[%s3847_s0 + %s3339_s4]]   ;;  %s3342_s16 = smov 13  }
   0xa   :  { %v160_v4 = vmul.f32 %v2800_v3, %v152_v2  ;;  %v2801_v5 = vld [vmem:[%s2767_s17] ss:$0 sm:$0xff]  ;;  %s2774_s11 = sld [smem:[%s3847_s0 + %s3340_s8]]   ;;  %s3343_s20 = smov 15  }
   0xb   :  { %v256_v7 = vld [vmem:[%s2770_s21] sm:$0xff]  ;;  %s2775_s15 = sld [smem:[%s3847_s0 + %s3341_s12]]   ;;  %s3344_s24 = smov 14  }
   0xc   :  { %v168_v6 = vadd.f32 %v2801_v5, %v160_v4  ;;  %v2802_v8 = vld [vmem:[%s2769_s25] ss:$0 sm:$0xff]  ;;  %s2776_s19 = sld [smem:[%s3847_s0 + %s3342_s16]]   ;;  %s3345_s28 = smov 19  }
   0xd   :  { %v339_v13 = vld [vmem:[%s2772_s29] sm:$0xff]  ;;  %s2778_s23 = sld [smem:[%s3847_s0 + %s3343_s20]]   ;;  %s3346_s2 = smov 17  }
   0xe   :  { %3007 = vmatmul.mubr.msk.f32.vlgmr.msra.gmra.mrb[0].mxu0 %vm177_vm2, %v168_v6  ;;  %v2805_v14 = vld [vmem:[%s2771_s3] ss:$0 sm:$0xff]  ;;  %s2777_s27 = sld [smem:[%s3847_s0 + %s3344_s24]]   ;;  %s3347_s6 = smov 2  }
   0xf   :  { %3011 = vmatprep.mubr.msk.f32.mxu0 %vm3332_vm0, %v3330_v0  ;;  %3010 = vmatpush3.msra.mxu0 %v256_v7  ;;  %v421_v15 = vld [vmem:[%s2764_s7] sm:$0xff]  ;;  %s2782_s1 = sld [smem:[%s3847_s0 + %s3345_s28]]   ;;  %s3348_s10 = smov 20  }
  0x10   :  { %3014 = vmatprep.subr.mxu0 %v3330_v0  ;;  %v2809_v16 = vld [vmem:[%s2774_s11] ss:$0 sm:$0xff]  ;;  %s2780_s5 = sld [smem:[%s3847_s0 + %s3346_s2]]   ;;  %s3350_s14 = smov 16  }
  0x11   :  { %v429_v20 = vmul.f32 %v2809_v16, %v421_v15  ;;  %v2810_v21 = vld [vmem:[%s2775_s15] ss:$0 sm:$0xff]  ;;  %s3451_s9 = sld [smem:[%s3847_s0 + %s3347_s6]]   ;;  %s3351_s18 = smov 21  }
  0x12   :  { %v438_v23 = vld [vmem:[%s2776_s19] sm:$0xff]  ;;  %s2783_s13 = sld [smem:[%s3847_s0 + %s3348_s10]]   ;;  %s3352_s22 = smov 96  }
  0x13   :  { %v437_v24 = vadd.f32 %v2810_v21, %v429_v20  ;;  %v520_v25 = vld [vmem:[%s2778_s23] sm:$0xff]  ;;  %s2779_s17 = sld [smem:[%s3847_s0 + %s3350_s14]]   ;;  %s3353_s23 = smov 32  }
  0x14   :  { %v2811_v28 = vld [vmem:[%s2777_s27] ss:$0 sm:$0xff]  ;;  %s2784_s21 = sld [smem:[%s3847_s0 + %s3351_s18]]   ;;  %s3354_s24 = smov 80  }
  0x15   :  { %v690_v33 = vld [vmem:[%s2782_s1] sm:$0xff]  ;;  %v691_v34 = vld [vmem:[%s2782_s1 + $0x8] sm:$0xff]  ;;  %s3355_s25 = smov 25   ;;  %s3356_s29 = smov 10  }
  0x16   :  { %v3110_v35 = vpack.c.bf16 %v691_v34, %v690_v33  ;;  %v602_v36 = vld [vmem:[%s2780_s5] sm:$0xff]  ;;  %s3546_s28 = sld [smem:[%s3847_s0 + %s3355_s25]]   ;;  %s3357_s3 = smov 18  }
  0x17   :  { %v684_v37 = vld [vmem:[%s3451_s9] sm:$0xff]  ;;  %3030 = vmatpush3.msra.mxu1 %v602_v36  ;;  %v685_v38 = vld [vmem:[%s3451_s9 + $0x8] sm:$0xff]  ;;  %s2773_s2 = sld [smem:[%s3847_s0 + %s3356_s29]]   ;;  %s3358_s7 = smov 27  }
  0x18   :  { %3114 = vmatprep.subr.bf16.mxu1 %v3349_v39  ;;  %v813_v40 = vld [vmem:[%s2783_s13] sm:$0xff]  ;;  %v814_v41 = vld [vmem:[%s2783_s13 + $0x8] sm:$0xff]  ;;  %s2781_s6 = sld [smem:[%s3847_s0 + %s3357_s3]]   ;;  %s3359_s11 = smov 22  }
  0x19   :  { %v3461_v42 = vpack.c.bf16 %v814_v41, %v813_v40  ;;  %v2813_v43 = vld [vmem:[%s2779_s17] ss:$0 sm:$0xff]  ;;  %s3559_s10 = sld [smem:[%s3847_s0 + %s3358_s7]]   ;;  %s3361_s19 = smov 30  }
  0x1a   :  { %v3483_v50 = vld [vmem:[%s2784_s21] ss:$0 sm:$0xff]  ;;  %s2785_s15 = sld [smem:[%s3847_s0 + %s3359_s11]]   ;;  %s3366_s13 = smov 31  }
  0x1b   :  { %s2795_s12 = sld [smem:[%s3847_s0 + %s3353_s23]]   ;;  %s3368_s20 = smov 35  }
  0x1c   :  { %s2794_s16 = sld [smem:[%s3847_s0 + %s3366_s13]]   ;;  %s3369_s25 = smov 33  }
  0x1d   :  { %s3370_s29 = smov 36  }
  0xe1   :  { %v251_v9 = vpop.f32.mrb[0].mxu0 }
  0xe2   :  { %v252_v10 = vadd.f32 %v2802_v8, %v251_v9  ;;  %v3008_v11 = vpop.f32.mrb[1].mxu0 }
  0xe4   :  { %v255_v12 = vmax.f32 %v252_v10, 0.0 }
  0xe6   :  { %3012 = vmatmul.mubr.msk.f32.vlgmr.msra.gmra.mrb[2].mxu0 %vm264_vm3, %v255_v12 }
  0xe7   :  { %3016 = vmatprep.mubr.msk.f32.mxu0 %vm3332_vm0, %v3330_v0  ;;  %3015 = vmatpush3.msra.mxu0 %v339_v13 }
  0xe8   :  { %3019 = vmatprep.subr.mxu0 %v3330_v0 }
 0x1b9   :  { %v334_v17 = vpop.f32.mrb[2].mxu0 }
 0x1ba   :  { %v335_v18 = vadd.f32 %v2805_v14, %v334_v17  ;;  %v3013_v19 = vpop.f32.mrb[3].mxu0 }
 0x1bc   :  { %v338_v22 = vmax.f32 %v335_v18, 0.0 }
 0x1be   :  { %3017 = vmatmul.mubr.msk.f32.vlgmr.msra.gmra.mrb[4].mxu0 %vm264_vm3, %v338_v22  ;;  %v686_v22 = vld [vmem:[%s3451_s9 + $0x10] sm:$0xff] }
 0x1bf   :  { %3020 = vmatpush3.msra.mxu0 %v438_v23  ;;  %3021 = vmatprep.mubr.msk.f32.mxu0 %vm3332_vm0, %v3330_v0  ;;  %v687_v23 = vld [vmem:[%s3451_s9 + $0x18] sm:$0xff] }
 0x1c0   :  { %3024 = vmatprep.subr.mxu0 %v3330_v0 }
 0x1c2   :  { %3022 = vmatmul.mubr.msk.f32.vlgmr.msra.gmra.mrb[6].mxu0 %vm264_vm3, %v437_v24 }
 0x1c3   :  { %3026 = vmatprep.mubr.msk.f32.mxu0 %vm3332_vm0, %v3330_v0  ;;  %3025 = vmatpush3.msra.mxu0 %v520_v25 }
 0x1c4   :  { %3111 = vmatprep.subr.bf16.mxu0 %v3110_v35 }
 0x291   :  { %v3439_v26 = vpop.f32.mrb[4].mxu0 }
 0x292   :  { %v3018_v27 = vpop.f32.mrb[5].mxu0 }
 0x295   :  { %v515_v29 = vpop.f32.mrb[6].mxu0 }
 0x296   :  { %v516_v30 = vadd.f32 %v2811_v28, %v515_v29  ;;  %v3023_v31 = vpop.f32.mrb[7].mxu0 }
 0x298   :  { %v519_v32 = vmax.f32 %v516_v30, 0.0 }
 0x29a   :  { %3027 = vmatmul.mubr.msk.f32.vlgmr.msra.gmra.mrb[8].mxu0 %vm264_vm3, %v519_v32 }
 0x29b   :  { %3113 = vmatpush3.bf16.msra.mxu0 %v3110_v35  ;;  %3038 = vmatprep.mubr.msk.f32.mxu0 %vm699_vm4, %v684_v37 }
 0x29c   :  { %3123 = vmatprep.subr.bf16.mxu0 %v3349_v39 }
 0x29e   :  { %3039 = vmatmul.mubr.msk.f32.vlgmr.msra.gmra.mrb[10].mxu0 %vm699_vm4, %v685_v38 }
 0x29f   :  { %3125 = vmatpush3.bf16.msra.mxu0 %v3461_v42  ;;  %3041 = vmatprep.mubr.msk.f32.mxu0 %vm699_vm4, %v686_v22 }
 0x2a0   :  { %3129 = vmatprep.subr.bf16.mxu0 %v3349_v39 }
 0x2a2   :  { %3042 = vmatmul.mubr.msk.f32.gmra.mrb[12].mxu0 %vm699_vm4, %v687_v23 }
 0x36d   :  { %v597_v44 = vpop.f32.mrb[8].mxu0 }
 0x36e   :  { %v598_v45 = vadd.f32 %v2813_v43, %v597_v44  ;;  %v3028_v46 = vpop.f32.mrb[9].mxu0 }
 0x370   :  { %v601_v47 = vmax.f32 %v598_v45, 0.0 }
 0x371   :  { %v3040_v48 = vpop.f32.mrb[10].mxu0 }
 0x372   :  { %3032 = vmatmul.mubr.msk.f32.vlgmr.msra.gmra.mrb[0].mxu1 %vm264_vm3, %v601_v47  ;;  %v784_v49 = vpop.f32.mrb[11].mxu0  ;;  %v790_v8 = vadd.f32 %v3040_v48, %v3483_v50  ;;  %v688_v47 = vld [vmem:[%s3451_s9 + $0x20] sm:$0xff]  ;;  %v689_v48 = vld [vmem:[%s3451_s9 + $0x28] sm:$0xff] }
 0x373   :  { %3116 = vmatpush3.bf16.msra.mxu1 %v3461_v42  ;;  %3051 = vmatprep.mubr.msk.f32.mxu1 %vm3332_vm0, %v3330_v0  ;;  %v785_v53 = vadd.f32 %v3483_v50, %v784_v49 }
 0x374   :  { %3117 = vmatprep.subr.bf16.mxu1 %v3349_v39  ;;  %3044 = vmatprep.mubr.msk.f32.mxu0 %vm699_vm4, %v688_v47 }
 0x375   :  { %v3043_v28 = vpop.f32.mrb[12].mxu0  ;;  %3045 = vmatmul.mubr.msk.f32.gmra.mrb[14].mxu0 %vm699_vm4, %v689_v48 }
 0x376   :  { %3052 = vmatmul.mubr.f32.vlgmr.msra.gmra.mrb[2].mxu1 %v3330_v0  ;;  %v794_v29 = vpop.f32.mrb[13].mxu0  ;;  %3072 = vmatprep.mubr.msk.f32.mxu0 %vm3332_vm0, %v3330_v0 }
 0x377   :  { %3119 = vmatpush3.bf16.msra.mxu1 %v3461_v42  ;;  %3058 = vmatprep.mubr.msk.f32.mxu1 %vm3332_vm0, %v3330_v0  ;;  %v795_v31 = vadd.f32 %v3483_v50, %v794_v29 }
 0x378   :  { %3120 = vmatprep.subr.bf16.mxu1 %v3349_v39 }
 0x445   :  { %v3485_v51 = vpop.f32.mrb[0].mxu1 }
 0x446   :  { %v3033_v52 = vpop.f32.mrb[1].mxu1 }
 0x449   :  { %v884_v54 = vpop.f32.mrb[2].mxu1 }
 0x44a   :  { %v888_v55 = vadd.f32 %v884_v54, %v785_v53  ;;  %v3053_v56 = vpop.f32.mrb[3].mxu1  ;;  %v3522_v54 = vpop.f32.mrb[14].mxu0 }
 0x44c   :  { %3278 = vtanh.f32 %v888_v55  ;;  %v2824_v58 = vmul.f32 -1.442695, %v888_v55  ;;  %v804_v55 = vpop.f32.mrb[15].mxu0 }
 0x44e   :  { %3280 = vpow2.f32 %v2824_v58 }
 0x456   :  { %v3279_v57 = vpop.eup %3278 }
 0x457   :  { %898 = vrot.lane.b32.xlu0 %v3279_v57, %s3352_s22  ;;  %v800_v57 = vadd.f32 %v3043_v28, %v3483_v50 }
 0x458   :  { %v3281_v59 = vpop.eup %3280 }
 0x459   :  { %v892_v60 = vadd.f32 1.0, %v3281_v59 }
 0x45b   :  { %3282 = vrcp.f32 %v892_v60 }
 0x465   :  { %v3283_v61 = vpop.eup %3282 }
 0x466   :  { %v896_v1 = vmul.f32 0.0, %v3283_v61 }
 0x4c9   :  { %v899_v62 = vpop.permute.xlu0 %898 }
 0x4ca   :  { %v901_v63 = vmul.f32 %v3283_v61, %v899_v62 }
 0x4cc   :  { %903 = vrot.lane.b32.xlu0 %v901_v63, %s3350_s14 }
 0x53e   :  { %v904_v2 = vpop.permute.xlu0 %903 }
 0x53f   :  { %v906_v3 = vadd.f32 %v904_v2, %v896_v1 }
 0x541   :  { %3284 = vtanh.f32 %v906_v3 }
 0x54b   :  { %v3285_v4 = vpop.eup %3284 }
 0x54c   :  { %909 = vrot.lane.b32.xlu1 %v3285_v4, %s3353_s23 }
 0x5be   :  { %v910_v5 = vpop.permute.xlu1 %909 }
 0x5bf   :  { %v912_v6 = vmul.f32 %v3283_v61, %v910_v5 }
 0x5c1   :  { %914 = vrot.lane.b32.xlu1 %v912_v6, %s3354_s24 }
 0x633   :  { %v915_v7 = vpop.permute.xlu1 %914 }
 0x634   :  { %3059 = vmatmul.mubr.msk.f32.vlgmr.msra.gmra.mrb[4].mxu1 %vm699_vm4, %v915_v7 }
 0x635   :  { %3122 = vmatpush3.bf16.msra.mxu1 %v3461_v42  ;;  %3065 = vmatprep.mubr.msk.f32.mxu1 %vm3332_vm0, %v3330_v0 }
 0x636   :  { %3126 = vmatprep.subr.bf16.mxu1 %v3349_v39 }
 0x707   :  { %v984_v9 = vpop.f32.mrb[4].mxu1 }
 0x708   :  { %v988_v10 = vadd.f32 %v984_v9, %v790_v8  ;;  %v3060_v11 = vpop.f32.mrb[5].mxu1 }
 0x709   :  { %v805_v11 = vadd.f32 %v3483_v50, %v804_v55 }
 0x70a   :  { %3286 = vtanh.f32 %v988_v10  ;;  %v2826_v13 = vmul.f32 -1.442695, %v988_v10 }
 0x70c   :  { %3288 = vpow2.f32 %v2826_v13 }
 0x714   :  { %v3287_v12 = vpop.eup %3286 }
 0x715   :  { %998 = vrot.lane.b32.xlu0 %v3287_v12, %s3352_s22 }
 0x716   :  { %v3289_v14 = vpop.eup %3288 }
 0x717   :  { %v992_v15 = vadd.f32 1.0, %v3289_v14 }
 0x719   :  { %3290 = vrcp.f32 %v992_v15 }
 0x723   :  { %v3291_v16 = vpop.eup %3290 }
 0x724   :  { %v996_v19 = vmul.f32 %v3291_v16, %v906_v3 }
 0x787   :  { %v999_v17 = vpop.permute.xlu0 %998 }
 0x788   :  { %v1001_v18 = vmul.f32 %v3291_v16, %v999_v17 }
 0x78a   :  { %1003 = vrot.lane.b32.xlu1 %v1001_v18, %s3350_s14 }
 0x7fc   :  { %v1004_v20 = vpop.permute.xlu1 %1003 }
 0x7fd   :  { %v1006_v21 = vadd.f32 %v1004_v20, %v996_v19 }
 0x7ff   :  { %3292 = vtanh.f32 %v1006_v21 }
 0x809   :  { %v3293_v24 = vpop.eup %3292 }
 0x80a   :  { %1009 = vrot.lane.b32.xlu0 %v3293_v24, %s3353_s23 }
 0x87c   :  { %v1010_v25 = vpop.permute.xlu0 %1009 }
 0x87d   :  { %v1012_v27 = vmul.f32 %v3291_v16, %v1010_v25 }
 0x87f   :  { %1014 = vrot.lane.b32.xlu1 %v1012_v27, %s3354_s24  ;;  %v1498_v27 = vld [vmem:[%s3546_s28 + $0x8] sm:$0xff] }
 0x8f1   :  { %v1015_v30 = vpop.permute.xlu1 %1014 }
 0x8f2   :  { %3066 = vmatmul.mubr.msk.f32.vlgmr.msra.gmra.mrb[6].mxu1 %vm699_vm4, %v1015_v30  ;;  %v2807_v30 = vld [vmem:[%s2773_s2] ss:$0 sm:$0xff]  ;;  %s3364_s2 = smov 24  }
 0x8f3   :  { %3128 = vmatpush3.bf16.msra.mxu1 %v3461_v42  ;;  %3079 = vmatprep.mubr.msk.f32.mxu1 %vm3332_vm0, %v3330_v0  ;;  %s2787_s5 = sld [smem:[%s3847_s0 + %s3364_s2]]  }
 0x8f4   :  { %3132 = vmatprep.subr.bf16.mxu1 %v3349_v39  ;;  %s2799_s2 = sld [smem:[%s3847_s0 + %s3370_s29]]  }
 0x9c5   :  { %v1084_v32 = vpop.f32.mrb[6].mxu1 }
 0x9c6   :  { %v1088_v33 = vadd.f32 %v1084_v32, %v795_v31  ;;  %v3067_v34 = vpop.f32.mrb[7].mxu1  ;;  %v417_v31 = vadd.f32 %v2807_v30, %v3439_v26  ;;  %v1497_v32 = vld [vmem:[%s3546_s28] sm:$0xff] }
 0x9c7   :  { %v1502_v34 = vld [vmem:[%s3546_s28 + $0x28] sm:$0xff] }
 0x9c8   :  { %3294 = vtanh.f32 %v1088_v33  ;;  %v2828_v36 = vmul.f32 -1.442695, %v1088_v33 }
 0x9ca   :  { %3296 = vpow2.f32 %v2828_v36  ;;  %v1501_v36 = vld [vmem:[%s3546_s28 + $0x20] sm:$0xff] }
 0x9d2   :  { %v3295_v35 = vpop.eup %3294 }
 0x9d3   :  { %1098 = vrot.lane.b32.xlu0 %v3295_v35, %s3352_s22  ;;  %v3566_v35 = vmax.f32 %v417_v31, 0.0 }
 0x9d4   :  { %v3297_v37 = vpop.eup %3296 }
 0x9d5   :  { %v1092_v38 = vadd.f32 1.0, %v3297_v37  ;;  %v2815_v37 = vld [vmem:[%s2781_s6] ss:$0 sm:$0xff]  ;;  %s3365_s6 = smov 28  }
 0x9d6   :  { %v680_v26 = vadd.f32 %v2815_v37, %v3485_v51  ;;  %s2791_s9 = sld [smem:[%s3847_s0 + %s3365_s6]]  }
 0x9d7   :  { %3298 = vrcp.f32 %v1092_v38  ;;  %v1754_v38 = vld [vmem:[%s3559_s10 + $0x18] sm:$0xff] }
 0x9e1   :  { %v3299_v40 = vpop.eup %3298 }
 0x9e2   :  { %v1096_v44 = vmul.f32 %v3299_v40, %v1006_v21 }
 0xa45   :  { %v1099_v41 = vpop.permute.xlu0 %1098 }
 0xa46   :  { %v1101_v43 = vmul.f32 %v3299_v40, %v1099_v41  ;;  %v3578_v41 = vmax.f32 %v680_v26, 0.0 }
 0xa48   :  { %1103 = vrot.lane.b32.xlu1 %v1101_v43, %s3350_s14  ;;  %v810_v43 = vadd.f32 %v3522_v54, %v3483_v50 }
 0xaba   :  { %v1104_v45 = vpop.permute.xlu1 %1103 }
 0xabb   :  { %v1106_v46 = vadd.f32 %v1104_v45, %v1096_v44 }
 0xabd   :  { %3300 = vtanh.f32 %v1106_v46 }
 0xac7   :  { %v3301_v49 = vpop.eup %3300 }
 0xac8   :  { %1109 = vrot.lane.b32.xlu0 %v3301_v49, %s3353_s23 }
 0xb3a   :  { %v1110_v52 = vpop.permute.xlu0 %1109 }
 0xb3b   :  { %v1112_v53 = vmul.f32 %v3299_v40, %v1110_v52  ;;  %v1753_v40 = vld [vmem:[%s3559_s10 + $0x10] sm:$0xff] }
 0xb3d   :  { %1114 = vrot.lane.b32.xlu1 %v1112_v53, %s3354_s24 }
 0xbaf   :  { %v1115_v56 = vpop.permute.xlu1 %1114 }
 0xbb0   :  { %3073 = vmatmul.mubr.msk.f32.vlgmr.msra.gmra.mrb[16].mxu0 %vm699_vm4, %v1115_v56 }
 0xbb1   :  { %3131 = vmatpush3.bf16.msra.mxu0 %v3461_v42  ;;  %3086 = vmatprep.mubr.msk.f32.mxu0 %vm3332_vm0, %v3330_v0 }
 0xbb2   :  { %1538 = vmatprep.subr.mxu0 %v1498_v27 }
 0xc83   :  { %v1184_v58 = vpop.f32.mrb[16].mxu0 }
 0xc84   :  { %v1188_v59 = vadd.f32 %v1184_v58, %v800_v57  ;;  %v3074_v60 = vpop.f32.mrb[17].mxu0 }
 0xc86   :  { %3302 = vtanh.f32 %v1188_v59  ;;  %v2830_v62 = vmul.f32 -1.442695, %v1188_v59 }
 0xc88   :  { %3304 = vpow2.f32 %v2830_v62 }
 0xc90   :  { %v3303_v61 = vpop.eup %3302 }
 0xc91   :  { %1198 = vrot.lane.b32.xlu0 %v3303_v61, %s3352_s22 }
 0xc92   :  { %v3305_v63 = vpop.eup %3304 }
 0xc93   :  { %v1192_v1 = vadd.f32 1.0, %v3305_v63  ;;  %v1413_v63 = vld [vmem:[%s2785_s15] sm:$0xff] }
 0xc95   :  { %3306 = vrcp.f32 %v1192_v1  ;;  %v1414_v1 = vld [vmem:[%s2785_s15 + $0x8] sm:$0xff] }
 0xc9f   :  { %v3307_v2 = vpop.eup %3306 }
 0xca0   :  { %v1196_v4 = vmul.f32 %v3307_v2, %v1106_v46 }
 0xd03   :  { %v1199_v3 = vpop.permute.xlu0 %1198 }
 0xd04   :  { %v1201_v42 = vmul.f32 %v3307_v2, %v1199_v3 }
 0xd06   :  { %1203 = vrot.lane.b32.xlu1 %v1201_v42, %s3350_s14  ;;  %v1500_v42 = vld [vmem:[%s3546_s28 + $0x18] sm:$0xff] }
 0xd78   :  { %v1204_v5 = vpop.permute.xlu1 %1203 }
 0xd79   :  { %v1206_v6 = vadd.f32 %v1204_v5, %v1196_v4 }
 0xd7b   :  { %3308 = vtanh.f32 %v1206_v6 }
 0xd85   :  { %v3309_v7 = vpop.eup %3308 }
 0xd86   :  { %1209 = vrot.lane.b32.xlu0 %v3309_v7, %s3353_s23 }
 0xdf8   :  { %v1210_v8 = vpop.permute.xlu0 %1209 }
 0xdf9   :  { %v1212_v9 = vmul.f32 %v3307_v2, %v1210_v8  ;;  %v3133_v2 = vpack.c.bf16 %v1414_v1, %v1413_v63  ;;  %v1499_v8 = vld [vmem:[%s3546_s28 + $0x10] sm:$0xff]  ;;  %s3363_s28 = smov 23  }
 0xdfa   :  { %s2786_s1 = sld [smem:[%s3847_s0 + %s3363_s28]]  }
 0xdfb   :  { %1214 = vrot.lane.b32.xlu1 %v1212_v9, %s3354_s24  ;;  %s2796_s28 = sld [smem:[%s3847_s0 + %s3369_s25]]  }
 0xe6d   :  { %v1215_v10 = vpop.permute.xlu1 %1214 }
 0xe6e   :  { %3080 = vmatmul.mubr.msk.f32.vlgmr.msra.gmra.mrb[8].mxu1 %vm699_vm4, %v1215_v10  ;;  %v1752_v10 = vld [vmem:[%s3559_s10 + $0x8] sm:$0xff] }
 0xe6f   :  { %3093 = vmatprep.mubr.msk.f32.mxu1 %vm3332_vm0, %v3330_v0  ;;  %3134 = vmatpush3.bf16.msra.mxu1 %v3133_v2 }
 0xe70   :  { %1609 = vmatprep.subr.mxu1 %v1500_v42 }
 0xf41   :  { %v1284_v12 = vpop.f32.mrb[8].mxu1 }
 0xf42   :  { %v1288_v13 = vadd.f32 %v1284_v12, %v805_v11  ;;  %v3081_v14 = vpop.f32.mrb[9].mxu1  ;;  %v1751_v11 = vld [vmem:[%s3559_s10] sm:$0xff]  ;;  %v1756_v12 = vld [vmem:[%s3559_s10 + $0x28] sm:$0xff] }
 0xf44   :  { %3310 = vtanh.f32 %v1288_v13  ;;  %v2832_v16 = vmul.f32 -1.442695, %v1288_v13  ;;  %v1755_v13 = vld [vmem:[%s3559_s10 + $0x20] sm:$0xff] }
 0xf46   :  { %3312 = vpow2.f32 %v2832_v16 }
 0xf4e   :  { %v3311_v15 = vpop.eup %3310 }
 0xf4f   :  { %1298 = vrot.lane.b32.xlu0 %v3311_v15, %s3352_s22 }
 0xf50   :  { %v3313_v17 = vpop.eup %3312 }
 0xf51   :  { %v1292_v18 = vadd.f32 1.0, %v3313_v17 }
 0xf53   :  { %3314 = vrcp.f32 %v1292_v18 }
 0xf5d   :  { %v3315_v19 = vpop.eup %3314 }
 0xf5e   :  { %v1296_v22 = vmul.f32 %v3315_v19, %v1206_v6 }
 0xfc1   :  { %v1299_v20 = vpop.permute.xlu0 %1298 }
 0xfc2   :  { %v1301_v21 = vmul.f32 %v3315_v19, %v1299_v20  ;;  %v1505_v20 = vlaneseq }
 0xfc4   :  { %1303 = vrot.lane.b32.xlu1 %v1301_v21, %s3350_s14  ;;  %v1506_v21 = vshrl.u32 %v1505_v20, 7 }
 0xfc6   :  { %v3653_v27 = vsub.s32 3, %v1506_v21  ;;  %v3658_v31 = vsub.s32 0, %v1506_v21  ;;  %v3687_v63 = vsub.s32 5, %v1506_v21 }
0x1036   :  { %v1304_v23 = vpop.permute.xlu1 %1303 }
0x1037   :  { %v3539_v24 = vadd.f32 %v1304_v23, %v1296_v22  ;;  %v3648_v22 = vsub.s32 2, %v1506_v21 }
0x1039   :  { %3316 = vtanh.f32 %v3539_v24 }
0x1043   :  { %v3317_v25 = vpop.eup %3316 }
0x1044   :  { %1309 = vrot.lane.b32.xlu0 %v3317_v25, %s3353_s23 }
0x10b6   :  { %v1310_v28 = vpop.permute.xlu0 %1309 }
0x10b7   :  { %v1312_v29 = vmul.f32 %v3315_v19, %v1310_v28 }
0x10b9   :  { %1314 = vrot.lane.b32.xlu1 %v1312_v29, %s3354_s24 }
0x112b   :  { %v1315_v33 = vpop.permute.xlu1 %1314 }
0x112c   :  { %3087 = vmatmul.mubr.msk.f32.vlgmr.msra.gmra.mrb[18].mxu0 %vm699_vm4, %v1315_v33 }
0x112d   :  { %1539 = vmatpush1.msra.mxu0 %v1497_v32  ;;  %1602 = vmatprep.mubr.f32.mxu0 %v3330_v0  ;;  %v3660_v32 = vsub.s32 1, %v1506_v21 }
0x112e   :  { %1680 = vmatprep.subr.mxu0 %v1502_v34 }
0x1130   :  { %2837 = vmatmul.mubr.msk.f32.vlgmr.msra.gmra.mrb[20].mxu0 %vm264_vm3, %v3566_v35 }
0x1131   :  { %1681 = vmatpush1.msra.mxu0 %v1501_v36  ;;  %1744 = vmatprep.mubr.f32.mxu0 %v3330_v0 }
0x1132   :  { %1863 = vmatprep.subr.mxu0 %v1754_v38 }
0x1134   :  { %2839 = vmatmul.mubr.msk.f32.vlgmr.msra.gmra.mrb[22].mxu0 %vm264_vm3, %v3566_v35 }
0x1135   :  { %1864 = vmatpush1.msra.mxu0 %v1753_v40  ;;  %1927 = vmatprep.mubr.f32.mxu0 %v3330_v0 }
0x1138   :  { %2841 = vmatmul.mubr.msk.f32.vlgmr.msra.gmra.mrb[24].mxu0 %vm264_vm3, %v3578_v41 }
0x1139   :  { %2110 = vmatprep.mubr.f32.mxu0 %v3330_v0 }
0x11ff   :  { %v1384_v44 = vpop.f32.mrb[18].mxu0 }
0x1200   :  { %v1388_v51 = vadd.f32 %v1384_v44, %v810_v43  ;;  %v3088_v45 = vpop.f32.mrb[19].mxu0 }
0x1202   :  { %3318 = vtanh.f32 %v1388_v51  ;;  %v2834_v50 = vmul.f32 -1.442695, %v1388_v51 }
0x1203   :  { %v3585_v46 = vpop.f32.mrb[20].mxu0 }
0x1204   :  { %v3587_v47 = vpop.f32.mrb[21].mxu0  ;;  %3320 = vpow2.f32 %v2834_v50 }
0x1207   :  { %v3589_v48 = vpop.f32.mrb[22].mxu0 }
0x1208   :  { %v3591_v49 = vpop.f32.mrb[23].mxu0 }
0x120b   :  { %v3593_v52 = vpop.f32.mrb[24].mxu0 }
0x120c   :  { %v3319_v53 = vpop.eup %3318  ;;  %v3595_v55 = vpop.f32.mrb[25].mxu0 }
0x120d   :  { %1398 = vrot.lane.b32.xlu0 %v3319_v53, %s3352_s22  ;;  %s3635_s22 = sld [smem:[%s3847_s0 + %s3361_s19]]  }
0x120e   :  { %v3321_v54 = vpop.eup %3320 }
0x120f   :  { %v1392_v56 = vadd.f32 1.0, %v3321_v54 }
0x1211   :  { %3322 = vrcp.f32 %v1392_v56 }
0x1213   :  { %v2287_v17 = vld [vmem:[%s3635_s22 + $0x80] sm:$0xff]  ;;  %v2288_v18 = vld [vmem:[%s3635_s22 + $0x88] sm:$0xff]  ;;  %v2289_v33 = vld [vmem:[%s3635_s22 + $0x90] sm:$0xff] }
0x1214   :  { %v3135_v19 = vpack.c.bf16 %v2288_v18, %v2287_v17  ;;  %v2271_v25 = vld [vmem:[%s3635_s22] sm:$0xff]  ;;  %v2272_v28 = vld [vmem:[%s3635_s22 + $0x8] sm:$0xff]  ;;  %v2290_v34 = vld [vmem:[%s3635_s22 + $0x98] sm:$0xff] }
0x1215   :  { %v2319_v29 = vld [vmem:[%s3635_s22 + $0x180] sm:$0xff]  ;;  %v2320_v30 = vld [vmem:[%s3635_s22 + $0x188] sm:$0xff]  ;;  %v3137_v43 = vpack.c.bf16 %v2272_v28, %v2271_v25  ;;  %v2273_v53 = vld [vmem:[%s3635_s22 + $0x10] sm:$0xff]  ;;  %v3139_v56 = vpack.c.bf16 %v2290_v34, %v2289_v33 }
0x1216   :  { %v3167_v44 = vpack.c.bf16 %v2320_v30, %v2319_v29  ;;  %v2303_v51 = vld [vmem:[%s3635_s22 + $0x100] sm:$0xff]  ;;  %v2304_v45 = vld [vmem:[%s3635_s22 + $0x108] sm:$0xff] }
0x1217   :  { %v2291_v1 = vld [vmem:[%s3635_s22 + $0xa0] sm:$0xff]  ;;  %v2292_v2 = vld [vmem:[%s3635_s22 + $0xa8] sm:$0xff] }
0x1218   :  { %v2323_v17 = vld [vmem:[%s3635_s22 + $0x1a0] sm:$0xff]  ;;  %v2324_v18 = vld [vmem:[%s3635_s22 + $0x1a8] sm:$0xff] }
0x121b   :  { %v3323_v57 = vpop.eup %3322 }
0x121c   :  { %v1396_v60 = vmul.f32 %v3323_v57, %v3539_v24  ;;  %v2835_v24 = vld [vmem:[%s2786_s1] ss:$0 sm:$0xff] }
0x127f   :  { %v1399_v58 = vpop.permute.xlu0 %1398 }
0x1280   :  { %v1401_v59 = vmul.f32 %v3323_v57, %v1399_v58  ;;  %v2321_v58 = vld [vmem:[%s3635_s22 + $0x190] sm:$0xff] }
0x1282   :  { %1403 = vrot.lane.b32.xlu1 %v1401_v59, %s3350_s14  ;;  %s3360_s14 = smov 29   ;;  %v2322_v59 = vld [vmem:[%s3635_s22 + $0x198] sm:$0xff] }
0x1283   :  { %s3609_s18 = sld [smem:[%s3847_s0 + %s3360_s14]]  }
0x1289   :  { %v2006_v6 = vld [vmem:[%s3609_s18 + $0x8] sm:$0xff]  ;;  %v2005_v7 = vld [vmem:[%s3609_s18] sm:$0xff]  ;;  %v2008_v14 = vld [vmem:[%s3609_s18 + $0x18] sm:$0xff] }
0x128a   :  { %2046 = vmatprep.subr.mxu0 %v2006_v6  ;;  %v2007_v15 = vld [vmem:[%s3609_s18 + $0x10] sm:$0xff]  ;;  %v2010_v16 = vld [vmem:[%s3609_s18 + $0x28] sm:$0xff]  ;;  %v2009_v38 = vld [vmem:[%s3609_s18 + $0x20] sm:$0xff] }
0x128b   :  { %2047 = vmatpush1.msra.mxu0 %v2005_v7 }
0x128c   :  { %2188 = vmatprep.subr.mxu0 %v2010_v16  ;;  %v2276_v16 = vld [vmem:[%s3635_s22 + $0x28] sm:$0xff] }
0x12f4   :  { %v1404_v61 = vpop.permute.xlu1 %1403 }
0x12f5   :  { %v1406_v62 = vadd.f32 %v1404_v61, %v1396_v60 }
0x12f7   :  { %3324 = vtanh.f32 %v1406_v62  ;;  %v3685_v62 = vsub.s32 4, %v1506_v21 }
0x1301   :  { %v3325_v3 = vpop.eup %3324 }
0x1302   :  { %1409 = vrot.lane.b32.xlu0 %v3325_v3, %s3353_s23  ;;  %s3367_s23 = smov 34  }
0x1303   :  { %s2797_s19 = sld [smem:[%s3847_s0 + %s3367_s23]]  }
0x1374   :  { %v1410_v4 = vpop.permute.xlu0 %1409 }
0x1375   :  { %v1412_v5 = vmul.f32 %v3323_v57, %v1410_v4  ;;  %v2274_v57 = vld [vmem:[%s3635_s22 + $0x18] sm:$0xff] }
0x1377   :  { %1423 = vrot.lane.b32.xlu1 %v1412_v5, %s3354_s24  ;;  %s3362_s24 = smov 26   ;;  %v3169_v5 = vpack.c.bf16 %v2304_v45, %v2303_v51  ;;  %v2278_v51 = vld [vmem:[%s3635_s22 + $0x38] sm:$0xff]  ;;  %v2325_v45 = vld [vmem:[%s3635_s22 + $0x1b0] sm:$0xff] }
0x1378   :  { %s2789_s27 = sld [smem:[%s3847_s0 + %s3362_s24]]  }
0x1379   :  { %s2798_s24 = sld [smem:[%s3847_s0 + %s3368_s20]]  }
0x137e   :  { %v3650_v23 = vld [vmem:[%s2789_s27] sm:$0x3f] }
0x137f   :  { %v1770_v36 = vrot.slane %v3650_v23, %v3648_v22  ;;  %v1774_v50 = vrot.slane %v3650_v23, %v3653_v27  ;;  %v1762_v4 = vrot.slane %v3650_v23, %v3658_v31  ;;  %v1778_v30 = vrot.slane %v3650_v23, %v3685_v62 }
0x1381   :  { %v1930_v3 = vadd.f32 %v3593_v52, %v1770_v36  ;;  %v2306_v52 = vld [vmem:[%s3635_s22 + $0x118] sm:$0xff] }
0x13e9   :  { %v1424_v9 = vpop.permute.xlu1 %1423 }
0x13ea   :  { %3094 = vmatmul.mubr.msk.f32.vlgmr.msra.gmra.mrb[10].mxu1 %vm699_vm4, %v1424_v9  ;;  %v3171_v9 = vpack.c.bf16 %v2322_v59, %v2321_v58 }
0x13eb   :  { %1610 = vmatpush1.msra.mxu1 %v1499_v8  ;;  %1673 = vmatprep.mubr.f32.mxu1 %v3330_v0  ;;  %v3141_v8 = vpack.c.bf16 %v2274_v57, %v2273_v53  ;;  %v2326_v53 = vld [vmem:[%s3635_s22 + $0x1b8] sm:$0xff] }
0x13ec   :  { %1792 = vmatprep.subr.mxu1 %v1752_v10  ;;  %v2305_v10 = vld [vmem:[%s3635_s22 + $0x110] sm:$0xff] }
0x13ed   :  { %v3173_v33 = vpack.c.bf16 %v2306_v52, %v2305_v10  ;;  %v2297_v10 = vld [vmem:[%s3635_s22 + $0xd0] sm:$0xff]  ;;  %v2298_v52 = vld [vmem:[%s3635_s22 + $0xd8] sm:$0xff] }
0x13ee   :  { %2838 = vmatmul.mubr.msk.f32.vlgmr.msra.gmra.mrb[12].mxu1 %vm264_vm3, %v3566_v35  ;;  %v3664_v35 = vld [vmem:[%s2787_s5] sm:$0x3f] }
0x13ef   :  { %1793 = vmatpush1.msra.mxu1 %v1751_v11  ;;  %1856 = vmatprep.mubr.f32.mxu1 %v3330_v0  ;;  %v1520_v54 = vrot.slane %v3664_v35, %v3653_v27  ;;  %v1508_v60 = vrot.slane %v3664_v35, %v3658_v31  ;;  %v1512_v61 = vrot.slane %v3664_v35, %v3660_v32  ;;  %v2275_v11 = vld [vmem:[%s3635_s22 + $0x20] sm:$0xff] }
0x13f0   :  { %1934 = vmatprep.subr.mxu1 %v1756_v12  ;;  %v1932_v12 = vadd.f32 %v3595_v55, %v1774_v50  ;;  %v1528_v20 = vrot.slane %v3664_v35, %v3687_v63  ;;  %v2293_v55 = vld [vmem:[%s3635_s22 + $0xb0] sm:$0xff]  ;;  %v3145_v36 = vpack.c.bf16 %v2276_v16, %v2275_v11 }
0x13f1   :  { %v1605_v25 = vadd.f32 %v3585_v46, %v1508_v60  ;;  %v2307_v46 = vld [vmem:[%s3635_s22 + $0x120] sm:$0xff]  ;;  %v2281_v16 = vld [vmem:[%s3635_s22 + $0x50] sm:$0xff] }
0x13f2   :  { %2840 = vmatmul.mubr.msk.f32.vlgmr.msra.gmra.mrb[14].mxu1 %vm264_vm3, %v3578_v41 }
0x13f3   :  { %1935 = vmatpush1.msra.mxu1 %v1755_v13  ;;  %1998 = vmatprep.mubr.f32.mxu1 %v3330_v0 }
0x13f4   :  { %2117 = vmatprep.subr.mxu1 %v2008_v14  ;;  %v1766_v14 = vrot.slane %v3650_v23, %v3660_v32 }
0x13f6   :  { %2842 = vmatmul.mubr.msk.f32.vlgmr.msra.gmra.mrb[16].mxu1 %vm264_vm3, %v3578_v41  ;;  %v1516_v41 = vrot.slane %v3664_v35, %v3648_v22 }
0x13f7   :  { %2181 = vmatprep.mubr.f32.mxu1 %v3330_v0  ;;  %2118 = vmatpush1.msra.mxu1 %v2007_v15  ;;  %v3143_v15 = vpack.c.bf16 %v2292_v2, %v2291_v1  ;;  %v3179_v1 = vpack.c.bf16 %v2326_v53, %v2325_v45  ;;  %v2309_v2 = vld [vmem:[%s3635_s22 + $0x130] sm:$0xff]  ;;  %v2302_v53 = vld [vmem:[%s3635_s22 + $0xf8] sm:$0xff] }
0x13f8   :  { %3136 = vmatprep.subr.bf16.mxu1 %v3135_v19  ;;  %v1524_v19 = vrot.slane %v3664_v35, %v3685_v62  ;;  %v2301_v45 = vld [vmem:[%s3635_s22 + $0xf0] sm:$0xff] }
0x13fa   :  { %v1747_v57 = vadd.f32 %v3589_v48, %v1524_v19  ;;  %v1749_v48 = vadd.f32 %v3591_v49, %v1528_v20  ;;  %v2329_v19 = vld [vmem:[%s3635_s22 + $0x1d0] sm:$0xff]  ;;  %v2330_v20 = vld [vmem:[%s3635_s22 + $0x1d8] sm:$0xff] }
0x14bd   :  { %v1493_v37 = vpop.f32.mrb[10].mxu1 }
0x14be   :  { %v1494_v26 = vadd.f32 %v2835_v24, %v1493_v37  ;;  %v3095_v40 = vpop.f32.mrb[11].mxu1  ;;  %v2294_v24 = vld [vmem:[%s3635_s22 + $0xb8] sm:$0xff]  ;;  %v3175_v37 = vpack.c.bf16 %v2324_v18, %v2323_v17  ;;  %v3155_v17 = vpack.c.bf16 %v2298_v52, %v2297_v10 }
0x14bf   :  { %v1607_v40 = vadd.f32 %v3587_v47, %v1512_v61  ;;  %v2282_v18 = vld [vmem:[%s3635_s22 + $0x58] sm:$0xff] }
0x14c0   :  { %2843 = vmatmul.mubr.msk.f32.vlgmr.msra.gmra.mrb[26].mxu0 %vm264_vm3, %v1494_v26  ;;  %2844 = vmatmul.mubr.msk.f32.vlgmr.msra.gmra.mrb[18].mxu1 %vm264_vm3, %v1494_v26 }
0x14c1   :  { %v1675_v42 = vpop.f32.mrb[12].mxu1  ;;  %2189 = vmatpush1.msra.mxu0 %v2009_v38  ;;  %2252 = vmatprep.mubr.f32.mxu0 %v3330_v0  ;;  %v2308_v38 = vld [vmem:[%s3635_s22 + $0x128] sm:$0xff] }
0x14c2   :  { %v1676_v6 = vadd.f32 %v1675_v42, %v1516_v41  ;;  %v1677_v7 = vpop.f32.mrb[13].mxu1  ;;  %3138 = vmatpush3.bf16.msra.mxu1 %v3137_v43  ;;  %3168 = vmatprep.subr.bf16.mxu0 %v3167_v44  ;;  %v1782_v43 = vrot.slane %v3650_v23, %v3687_v63  ;;  %v3147_v44 = vpack.c.bf16 %v2294_v24, %v2293_v55  ;;  %v2279_v42 = vld [vmem:[%s3635_s22 + $0x40] sm:$0xff]  ;;  %v2300_v24 = vld [vmem:[%s3635_s22 + $0xe8] sm:$0xff] }
0x14c3   :  { %v1678_v13 = vadd.f32 %v1677_v7, %v1520_v54  ;;  %3140 = vmatprep.subr.bf16.mxu1 %v3139_v56  ;;  %v2295_v54 = vld [vmem:[%s3635_s22 + $0xc0] sm:$0xff]  ;;  %v2296_v56 = vld [vmem:[%s3635_s22 + $0xc8] sm:$0xff]  ;;  %v3177_v23 = vpack.c.bf16 %v2308_v38, %v2307_v46 }
0x14c4   :  { %v3710_v21 = vmul.f32 %v1930_v3, %v1676_v6  ;;  %2845 = vmatmul.mubr.msk.f32.vlgmr.msra.gmra.mrb[28].mxu0 %vm264_vm3, %v1494_v26  ;;  %v2277_v26 = vld [vmem:[%s3635_s22 + $0x30] sm:$0xff]  ;;  %v2310_v3 = vld [vmem:[%s3635_s22 + $0x138] sm:$0xff]  ;;  %v2280_v6 = vld [vmem:[%s3635_s22 + $0x48] sm:$0xff] }
0x14c5   :  { %v3716_v28 = vmul.f32 %v1932_v12, %v1678_v13  ;;  %v1858_v29 = vpop.f32.mrb[14].mxu1  ;;  %3170 = vmatpush3.bf16.msra.mxu0 %v3169_v5  ;;  %v3149_v61 = vpack.c.bf16 %v2278_v51, %v2277_v26  ;;  %v3151_v5 = vpack.c.bf16 %v2296_v56, %v2295_v54  ;;  %v2327_v7 = vld [vmem:[%s3635_s22 + $0x1c0] sm:$0xff]  ;;  %v3181_v49 = vpack.c.bf16 %v2310_v3, %v2309_v2  ;;  %v2332_v38 = vld [vmem:[%s3635_s22 + $0x1e8] sm:$0xff]  ;;  %v2285_v56 = vld [vmem:[%s3635_s22 + $0x70] sm:$0xff] }
0x14c6   :  { %v1859_v34 = vadd.f32 %v1858_v29, %v1762_v4  ;;  %v1860_v35 = vpop.f32.mrb[15].mxu1  ;;  %3142 = vmatpush3.bf16.msra.mxu1 %v3141_v8  ;;  %3172 = vmatprep.subr.bf16.mxu0 %v3171_v9  ;;  %v2328_v8 = vld [vmem:[%s3635_s22 + $0x1c8] sm:$0xff]  ;;  %v3153_v12 = vpack.c.bf16 %v2280_v6, %v2279_v42  ;;  %v2299_v55 = vld [vmem:[%s3635_s22 + $0xe0] sm:$0xff]  ;;  %v3157_v29 = vpack.c.bf16 %v2282_v18, %v2281_v16 }
0x14c7   :  { %v1861_v41 = vadd.f32 %v1860_v35, %v1766_v14  ;;  %3144 = vmatprep.subr.bf16.mxu1 %v3143_v15  ;;  %v3183_v13 = vpack.c.bf16 %v2328_v8, %v2327_v7  ;;  %v2311_v14 = vld [vmem:[%s3635_s22 + $0x140] sm:$0xff]  ;;  %v2312_v15 = vld [vmem:[%s3635_s22 + $0x148] sm:$0xff]  ;;  %v3163_v54 = vpack.c.bf16 %v2302_v53, %v2301_v45 }
0x14c8   :  { %v3729_v50 = vmul.f32 %v1859_v34, %v1605_v25  ;;  %v3185_v25 = vpack.c.bf16 %v2312_v15, %v2311_v14  ;;  %v2314_v34 = vld [vmem:[%s3635_s22 + $0x158] sm:$0xff]  ;;  %v2283_v35 = vld [vmem:[%s3635_s22 + $0x60] sm:$0xff]  ;;  %v2352_v42 = vld [vmem:[%s3635_s22 + $0x288] sm:$0xff] }
0x14c9   :  { %v3734_v58 = vmul.f32 %v1861_v41, %v1607_v40  ;;  %v2000_v47 = vpop.f32.mrb[16].mxu1  ;;  %3174 = vmatpush3.bf16.msra.mxu0 %v3173_v33  ;;  %v2313_v33 = vld [vmem:[%s3635_s22 + $0x150] sm:$0xff]  ;;  %v2331_v46 = vld [vmem:[%s3635_s22 + $0x1e0] sm:$0xff] }
0x14ca   :  { %v2001_v59 = vadd.f32 %v2000_v47, %v1778_v30  ;;  %v2002_v60 = vpop.f32.mrb[17].mxu1  ;;  %3146 = vmatpush3.bf16.msra.mxu1 %v3145_v36  ;;  %3176 = vmatprep.subr.bf16.mxu0 %v3175_v37  ;;  %v3187_v30 = vpack.c.bf16 %v2330_v20, %v2329_v19  ;;  %v3159_v36 = vpack.c.bf16 %v2300_v24, %v2299_v55  ;;  %v2284_v37 = vld [vmem:[%s3635_s22 + $0x68] sm:$0xff]  ;;  %v2333_v47 = vld [vmem:[%s3635_s22 + $0x1f0] sm:$0xff]  ;;  %v2351_v3 = vld [vmem:[%s3635_s22 + $0x280] sm:$0xff] }
0x14cb   :  { %v2003_v4 = vadd.f32 %v2002_v60, %v1782_v43  ;;  %3148 = vmatprep.subr.bf16.mxu1 %v3147_v44  ;;  %v3189_v26 = vpack.c.bf16 %v2314_v34, %v2313_v33  ;;  %v3161_v40 = vpack.c.bf16 %v2284_v37, %v2283_v35  ;;  %v3191_v41 = vpack.c.bf16 %v2332_v38, %v2331_v46  ;;  %v2315_v43 = vld [vmem:[%s3635_s22 + $0x160] sm:$0xff]  ;;  %v2316_v44 = vld [vmem:[%s3635_s22 + $0x168] sm:$0xff]  ;;  %v2317_v60 = vld [vmem:[%s3635_s22 + $0x170] sm:$0xff] }
0x14cc   :  { %v3743_v9 = vmul.f32 %v2001_v59, %v1747_v57  ;;  %v3193_v51 = vpack.c.bf16 %v2316_v44, %v2315_v43  ;;  %v2286_v57 = vld [vmem:[%s3635_s22 + $0x78] sm:$0xff]  ;;  %v2335_v16 = vld [vmem:[%s3635_s22 + $0x200] sm:$0xff]  ;;  %v2353_v19 = vld [vmem:[%s3635_s22 + $0x290] sm:$0xff] }
0x14cd   :  { %v3747_v11 = vmul.f32 %v2003_v4, %v1749_v48  ;;  %3178 = vmatpush3.bf16.msra.mxu0 %v3177_v23  ;;  %v3165_v23 = vpack.c.bf16 %v2286_v57, %v2285_v56  ;;  %v2334_v59 = vld [vmem:[%s3635_s22 + $0x1f8] sm:$0xff]  ;;  %v3199_v48 = vpack.c.bf16 %v2352_v42, %v2351_v3  ;;  %v2011_v4 = vld [vmem:[%s2791_s9] sm:$0x3f]  ;;  %v2337_v34 = vld [vmem:[%s3635_s22 + $0x210] sm:$0xff] }
0x14ce   :  { %3150 = vmatpush3.bf16.msra.mxu1 %v3149_v61  ;;  %3180 = vmatprep.subr.bf16.mxu0 %v3179_v1  ;;  %v2318_v61 = vld [vmem:[%s3635_s22 + $0x178] sm:$0xff]  ;;  %v3195_v1 = vpack.c.bf16 %v2334_v59, %v2333_v47  ;;  %v2024_v6 = vrot.slane %v2011_v4, %v3648_v22  ;;  %v2020_v7 = vrot.slane %v2011_v4, %v3660_v32  ;;  %v2339_v46 = vld [vmem:[%s3635_s22 + $0x220] sm:$0xff]  ;;  %v2340_v38 = vld [vmem:[%s3635_s22 + $0x228] sm:$0xff] }
0x14cf   :  { %3152 = vmatprep.subr.bf16.mxu1 %v3151_v5  ;;  %v3197_v2 = vpack.c.bf16 %v2318_v61, %v2317_v60  ;;  %v2016_v5 = vrot.slane %v2011_v4, %v3658_v31  ;;  %v2028_v8 = vrot.slane %v2011_v4, %v3653_v27  ;;  %v2032_v15 = vrot.slane %v2011_v4, %v3685_v62  ;;  %v2354_v32 = vld [vmem:[%s3635_s22 + $0x298] sm:$0xff]  ;;  %v2359_v44 = vld [vmem:[%s3635_s22 + $0x2c0] sm:$0xff]  ;;  %v2344_v56 = vld [vmem:[%s3635_s22 + $0x248] sm:$0xff] }
0x14d0   :  { %v2036_v22 = vrot.slane %v2011_v4, %v3687_v63  ;;  %v3203_v33 = vpack.c.bf16 %v2354_v32, %v2353_v19  ;;  %v2338_v63 = vld [vmem:[%s3635_s22 + $0x218] sm:$0xff]  ;;  %v2361_v57 = vld [vmem:[%s3635_s22 + $0x2d0] sm:$0xff]  ;;  %v2348_v4 = vld [vmem:[%s3635_s22 + $0x268] sm:$0xff] }
0x14d1   :  { %3182 = vmatpush3.bf16.msra.mxu0 %v3181_v49  ;;  %v2342_v43 = vld [vmem:[%s3635_s22 + $0x238] sm:$0xff]  ;;  %v2345_v60 = vld [vmem:[%s3635_s22 + $0x250] sm:$0xff] }
0x14d2   :  { %3154 = vmatpush3.bf16.msra.mxu1 %v3153_v12  ;;  %3184 = vmatprep.subr.bf16.mxu0 %v3183_v13  ;;  %v2362_v47 = vld [vmem:[%s3635_s22 + $0x2d8] sm:$0xff] }
0x14d3   :  { %3156 = vmatprep.subr.bf16.mxu1 %v3155_v17  ;;  %v2336_v17 = vld [vmem:[%s3635_s22 + $0x208] sm:$0xff]  ;;  %v3219_v59 = vpack.c.bf16 %v2362_v47, %v2361_v57  ;;  %v2346_v61 = vld [vmem:[%s3635_s22 + $0x258] sm:$0xff] }
0x14d4   :  { %v3221_v3 = vpack.c.bf16 %v2346_v61, %v2345_v60 }
0x14d5   :  { %3186 = vmatpush3.bf16.msra.mxu0 %v3185_v25  ;;  %v3201_v25 = vpack.c.bf16 %v2336_v17, %v2335_v16  ;;  %v2846_v17 = vld [vmem:[%s2794_s16] ss:$0 sm:$0xff] }
0x14d6   :  { %3158 = vmatpush3.bf16.msra.mxu1 %v3157_v29  ;;  %3188 = vmatprep.subr.bf16.mxu0 %v3187_v30 }
0x14d7   :  { %3160 = vmatprep.subr.bf16.mxu1 %v3159_v36  ;;  %v3205_v36 = vpack.c.bf16 %v2338_v63, %v2337_v34 }
0x14d9   :  { %3190 = vmatpush3.bf16.msra.mxu0 %v3189_v26  ;;  %v2358_v26 = vld [vmem:[%s3635_s22 + $0x2b8] sm:$0xff] }
0x14da   :  { %3162 = vmatpush3.bf16.msra.mxu1 %v3161_v40  ;;  %3192 = vmatprep.subr.bf16.mxu0 %v3191_v41  ;;  %v2341_v41 = vld [vmem:[%s3635_s22 + $0x230] sm:$0xff] }
0x14db   :  { %3164 = vmatprep.subr.bf16.mxu1 %v3163_v54  ;;  %v3213_v45 = vpack.c.bf16 %v2342_v43, %v2341_v41  ;;  %v2343_v54 = vld [vmem:[%s3635_s22 + $0x240] sm:$0xff] }
0x14dd   :  { %3194 = vmatpush3.bf16.msra.mxu0 %v3193_v51  ;;  %v2360_v51 = vld [vmem:[%s3635_s22 + $0x2c8] sm:$0xff] }
0x14de   :  { %3166 = vmatpush3.bf16.msra.mxu1 %v3165_v23  ;;  %3196 = vmatprep.subr.bf16.mxu0 %v3195_v1  ;;  %v3215_v53 = vpack.c.bf16 %v2360_v51, %v2359_v44  ;;  %v3217_v23 = vpack.c.bf16 %v2344_v56, %v2343_v54  ;;  %v2363_v1 = vld [vmem:[%s3635_s22 + $0x2e0] sm:$0xff] }
0x14df   :  { %3200 = vmatprep.subr.bf16.mxu1 %v3199_v48  ;;  %v2347_v48 = vld [vmem:[%s3635_s22 + $0x260] sm:$0xff] }
0x14e1   :  { %3198 = vmatpush3.bf16.msra.mxu0 %v3197_v2  ;;  %v2364_v2 = vld [vmem:[%s3635_s22 + $0x2e8] sm:$0xff] }
0x14e2   :  { %3231 = vmatprep.subr.bf16.mxu0 %v3349_v39  ;;  %v3223_v42 = vpack.c.bf16 %v2364_v2, %v2363_v1 }
0x1593   :  { %v2112_v10 = vpop.f32.mrb[26].mxu0  ;;  %v2183_v52 = vpop.f32.mrb[18].mxu1 }
0x1594   :  { %v2113_v49 = vadd.f32 %v2112_v10, %v2016_v5  ;;  %v2184_v12 = vadd.f32 %v2183_v52, %v2024_v6  ;;  %v2114_v13 = vpop.f32.mrb[27].mxu0  ;;  %v2185_v14 = vpop.f32.mrb[19].mxu1  ;;  %v2365_v5 = vld [vmem:[%s3635_s22 + $0x2f0] sm:$0xff]  ;;  %v2366_v6 = vld [vmem:[%s3635_s22 + $0x2f8] sm:$0xff] }
0x1595   :  { %v2115_v31 = vadd.f32 %v2114_v13, %v2020_v7  ;;  %v2186_v18 = vadd.f32 %v2185_v14, %v2028_v8  ;;  %v3225_v7 = vpack.c.bf16 %v2348_v4, %v2347_v48  ;;  %v3227_v8 = vpack.c.bf16 %v2366_v6, %v2365_v5  ;;  %v2349_v10 = vld [vmem:[%s3635_s22 + $0x270] sm:$0xff]  ;;  %v2350_v52 = vld [vmem:[%s3635_s22 + $0x278] sm:$0xff]  ;;  %v2586_v13 = vld [vmem:[%s2795_s12 + $0x8] sm:$0xff] }
0x1596   :  { %v2265_v27 = vmul.f32 %v3729_v50, %v2113_v49  ;;  %v2267_v20 = vmul.f32 %v3710_v21, %v2184_v12  ;;  %v2355_v50 = vld [vmem:[%s3635_s22 + $0x2a0] sm:$0xff]  ;;  %v2356_v21 = vld [vmem:[%s3635_s22 + $0x2a8] sm:$0xff]  ;;  %v3229_v49 = vpack.c.bf16 %v2350_v52, %v2349_v10 }
0x1597   :  { %v2266_v55 = vmul.f32 %v3734_v58, %v2115_v31  ;;  %v2268_v62 = vmul.f32 %v3716_v28, %v2186_v18  ;;  %v2254_v24 = vpop.f32.mrb[28].mxu0  ;;  %v3207_v37 = vpack.c.bf16 %v2356_v21, %v2355_v50  ;;  %v2585_v12 = vld [vmem:[%s2795_s12] sm:$0xff] }
0x1598   :  { %v2255_v29 = vadd.f32 %v2254_v24, %v2032_v15  ;;  %v2256_v30 = vpop.f32.mrb[29].mxu0  ;;  %v3232_v14 = vpack.c.bf16 %v2586_v13, %v2585_v12 }
0x1599   :  { %v2257_v35 = vadd.f32 %v2256_v30, %v2036_v22  ;;  %2438 = vmatprep.mubr.f32.mxu1 %v2266_v55  ;;  %2508 = vmatprep.mubr.f32.mxu0 %v2268_v62 }
0x159a   :  { %v2269_v58 = vmul.f32 %v3743_v9, %v2255_v29  ;;  %2439 = vmatmul.mubr.f32.vlgmr.msra.gmra.mrb[20].mxu1 %v2265_v27  ;;  %2509 = vmatmul.mubr.f32.vlgmr.msra.gmra.mrb[30].mxu0 %v2267_v20  ;;  %v2357_v9 = vld [vmem:[%s3635_s22 + $0x2b0] sm:$0xff]  ;;  %v2669_v29 = vld [vmem:[%s2797_s19 + $0x8] sm:$0xff] }
0x159b   :  { %v2270_v28 = vmul.f32 %v3747_v11, %v2257_v35  ;;  %3202 = vmatpush3.bf16.msra.mxu1 %v3201_v25  ;;  %3100 = vmatprep.mubr.msk.f32.mxu0 %vm3332_vm0, %v3330_v0  ;;  %v3209_v11 = vpack.c.bf16 %v2340_v38, %v2339_v46  ;;  %v3211_v40 = vpack.c.bf16 %v2358_v26, %v2357_v9 }
0x159c   :  { %3204 = vmatprep.subr.bf16.mxu1 %v3203_v33  ;;  %3233 = vmatpush3.bf16.msra.mxu0 %v3232_v14  ;;  %v78_v33 = vstv %s2798_s24 }
0x159d   :  { %2578 = vmatprep.mubr.f32.mxu1 %v2270_v28  ;;  %3234 = vmatprep.subr.bf16.mxu0 %v3349_v39  ;;  %v2668_v39 = vld [vmem:[%s2797_s19] sm:$0xff]  ;;  %79 = vst [vmem:[#allocation2] sm:$0x1] %v78_v33 }
0x159e   :  { %v3235_v30 = vpack.c.bf16 %v2669_v29, %v2668_v39 }
0x159f   :  { %3206 = vmatpush3.bf16.msra.mxu1 %v3205_v36 }
0x15a0   :  { %3208 = vmatprep.subr.bf16.mxu1 %v3207_v37 }
0x15a3   :  { %3210 = vmatpush3.bf16.msra.mxu1 %v3209_v11 }
0x15a4   :  { %3212 = vmatprep.subr.bf16.mxu1 %v3211_v40  ;;  %v2849_v21 = vld [vmem:[#allocation2] ss:$0 sm:$0xff] }
0x15a7   :  { %3214 = vmatpush3.bf16.msra.mxu1 %v3213_v45 }
0x15a8   :  { %3216 = vmatprep.subr.bf16.mxu1 %v3215_v53 }
0x15ab   :  { %3218 = vmatpush3.bf16.msra.mxu1 %v3217_v23 }
0x15ac   :  { %3220 = vmatprep.subr.bf16.mxu1 %v3219_v59 }
0x15af   :  { %3222 = vmatpush3.bf16.msra.mxu1 %v3221_v3 }
0x15b0   :  { %3224 = vmatprep.subr.bf16.mxu1 %v3223_v42 }
0x15b3   :  { %3226 = vmatpush3.bf16.msra.mxu1 %v3225_v7 }
0x15b4   :  { %3228 = vmatprep.subr.bf16.mxu1 %v3227_v8 }
0x15b7   :  { %3230 = vmatpush3.bf16.msra.mxu1 %v3229_v49 }
0x15ba   :  { %2579 = vmatmul.mubr.f32.vlgmr.msra.gmra.mrb[22].mxu1 %v2269_v58 }
0x166d   :  { %v2925_v15 = vpop.f32.mrb[20].mxu1  ;;  %v2960_v16 = vpop.f32.mrb[30].mxu0 }
0x166e   :  { %v2926_v31 = vpop.f32.mrb[21].mxu1  ;;  %v2961_v18 = vpop.f32.mrb[31].mxu0 }
0x166f   :  { %v2927_v22 = vadd.f32 %v2926_v31, %v2925_v15  ;;  %v2962_v19 = vadd.f32 %v2961_v18, %v2960_v16 }
0x1671   :  { %v2441_v32 = vadd.f32 %v2927_v22, %v2846_v17 }
0x1673   :  { %v2511_v27 = vadd.f32 %v2962_v19, %v2441_v32 }
0x168d   :  { %v2995_v20 = vpop.f32.mrb[22].mxu1 }
0x168e   :  { %v2996_v55 = vpop.f32.mrb[23].mxu1 }
0x168f   :  { %v2997_v62 = vadd.f32 %v2996_v55, %v2995_v20 }
0x1691   :  { %v2581_v24 = vadd.f32 %v2997_v62, %v2511_v27 }
0x1693   :  { %v2584_v25 = vmax.f32 %v2581_v24, 0.0 }
0x1695   :  { %3101 = vmatmul.mubr.msk.f32.vlgmr.msra.gmra.mrb[32].mxu0 %vm699_vm4, %v2584_v25 }
0x1696   :  { %3107 = vmatprep.mubr.msk.f32.mxu0 %vm3332_vm0, %v3330_v0  ;;  %3236 = vmatpush3.bf16.msra.mxu0 %v3235_v30  ;;  %v2847_v0 = vld [vmem:[%s2796_s28] ss:$0 sm:$0xff] }
0x1768   :  { %v2663_v34 = vpop.f32.mrb[32].mxu0 }
0x1769   :  { %v2664_v63 = vadd.f32 %v2847_v0, %v2663_v34  ;;  %v3102_v35 = vpop.f32.mrb[33].mxu0 }
0x176b   :  { %v2667_v50 = vmax.f32 %v2664_v63, 0.0 }
0x176d   :  { %3108 = vmatmul.mubr.msk.f32.vlgmr.msra.gmra.mrb[34].mxu0 %vm699_vm4, %v2667_v50 }
0x1840   :  { %v2746_v58 = vpop.f32.mrb[34].mxu0 }
0x1841   :  { %v2747_v28 = vadd.f32 %v2849_v21, %v2746_v58  ;;  %v3109_v36 = vpop.f32.mrb[35].mxu0 }
0x1843   :  { %v2851_v37 = vmul.f32 -1.442695, %v2747_v28 }
0x1845   :  { %3326 = vpow2.f32 %v2851_v37 }
0x184f   :  { %v3327_v46 = vpop.eup %3326 }
0x1850   :  { %v2753_v38 = vadd.f32 1.0, %v3327_v46 }
0x1852   :  { %3328 = vrcp.f32 %v2753_v38 }
0x185c   :  { %v3329_v9 = vpop.eup %3328 }
0x185d   :  { %v2756_v26 = vmul.f32 6.0, %v3329_v9 }
0x185f   :  { %v2757_v11 = vadd.f32 -3.0, %v2756_v26 }
0x1861   :  { %2759 = vst.msk [vmem:[%s2799_s2] sm:$0xff] %vm2758_vm5, %v2757_v11 }

</bundles_post_ra>
